<compile_context>
chip_gen: v7x
topology: tpu7x:2x2x1
jax: 0.10.0
libtpu: 0.0.40
codegen_flags: <defaults>
</compile_context>

<pallas_src>
import functools

import jax
import jax.numpy as jnp
from jax.experimental import pallas as pl
from jax.experimental.pallas import tpu as pltpu


# Max-pool padding sentinel: small enough that C * |w| * |sentinel| can never
# overflow the f32 accumulator (review concern about -1e30), large enough that
# it never wins a max against real activations.  Only discarded junk columns
# ever see it.
_POOL_PAD = -1e20
_VMEM_LIMIT = 48 * 1024 * 1024  # safe on v5e/v6e (128 MiB) and v7x (64 MiB)


# ---------------------------------------------------------------------------
# tile-size helpers
# ---------------------------------------------------------------------------
def _pick_lane_tile(P, lane_tile=None, target=2048):
    """Lane tile for the fused 1x1 stage: multiple of 128 dividing P, else P.

    Prefers a tile that yields >=2 grid steps (v7x dual-TensorCore / pipeline
    overlap) as long as it stays lane-dense.
    """
    if lane_tile is not None and P % lane_tile == 0 and (
            lane_tile % 128 == 0 or lane_tile == P):
        return lane_tile
    divisors = [t for t in range(128, min(P, target) + 1, 128) if P % t == 0]
    if not divisors:
        return P
    for t in reversed(divisors):
        if P // t >= 2:
            return t
    return divisors[-1]


def _pick_out_tile(O, out_tile=None):
    """Output-channel tile: divides O, multiple of 8 (or == O); prefers 256."""
    if out_tile is not None and O % out_tile == 0 and (
            out_tile % 8 == 0 or out_tile == O):
        return out_tile
    if O <= 256:
        return O
    for t in (256, 192, 128, 64, 32, 16, 8):
        if O % t == 0:
            return t
    return O


# ---------------------------------------------------------------------------
# kernels
# ---------------------------------------------------------------------------
def _fused_1x1_relu_kernel(*refs, n_out):
    """Several 1x1 conv+bias+ReLU branches sharing one input lane tile.

    refs = (x, w_1..w_k, b_1..b_k, o_1..o_k)
      x : (C, TS)     bf16 input tile (lanes = batch-folded spatial)
      w : (O_i, C)    bf16 weights (VMEM resident, constant index map)
      b : (O_i, 1)    f32 bias
      o : (O_i, TS)   output tile (bf16)
    """
    x_ref = refs[0]
    w_refs = refs[1:1 + n_out]
    b_refs = refs[1 + n_out:1 + 2 * n_out]
    o_refs = refs[1 + 2 * n_out:]
    x = x_ref[...]
    for w_ref, b_ref, o_ref in zip(w_refs, b_refs, o_refs):
        acc = jnp.dot(w_ref[...], x, preferred_element_type=jnp.float32)
        o_ref[...] = jnp.maximum(acc + b_ref[...], 0.0).astype(o_ref.dtype)


def _conv_relu_kernel(x_ref, w_ref, b_ref, o_ref, *, kh, kw, wp, m):
    """KxK conv (stride 1) + bias + ReLU; KH accumulating im2col matmuls.

    x_ref: (C, L)            batch-folded, zero-padded image (+ guard image)
    w_ref: (KH, TO, KW*C)    per-row weight slabs
    b_ref: (TO, 1)
    o_ref: (TO, M)           M = N*Hp*Wp (junk rows/cols sliced off outside)
    """
    acc = None
    for dh in range(kh):
        taps = [x_ref[:, dh * wp + dw: dh * wp + dw + m] for dw in range(kw)]
        mat = taps[0] if kw == 1 else jnp.concatenate(taps, axis=0)
        part = jnp.dot(w_ref[dh], mat, preferred_element_type=jnp.float32)
        acc = part if acc is None else acc + part
    o_ref[...] = jnp.maximum(acc + b_ref[...], 0.0).astype(o_ref.dtype)


def _maxpool_conv1x1_relu_kernel(x_ref, w_ref, b_ref, o_ref, *, pk, wp, m):
    """3x3/s1 max-pool fused with a 1x1 conv + bias + ReLU (batch-folded)."""
    pooled = None
    for dh in range(pk):
        for dw in range(pk):
            tap = x_ref[:, dh * wp + dw: dh * wp + dw + m]
            pooled = tap if pooled is None else jnp.maximum(pooled, tap)
    acc = jnp.dot(w_ref[...], pooled, preferred_element_type=jnp.float32)
    o_ref[...] = jnp.maximum(acc + b_ref[...], 0.0).astype(o_ref.dtype)


# ---------------------------------------------------------------------------
# wrappers (all operate in channel-first layout)
# ---------------------------------------------------------------------------
def fused_1x1_convs_relu(x_flat, weights, biases, *, out_dtype=jnp.bfloat16,
                         lane_tile=None, compute_dtype=jnp.bfloat16):
    """Apply several (conv1x1 + ReLU) branches to x_flat of shape (C, P)."""
    C, P = x_flat.shape
    n_out = len(weights)
    ts = _pick_lane_tile(P, lane_tile)
    R = P // ts

    x_flat = x_flat.astype(compute_dtype)
    w_list, b_list, o_chs = [], [], []
    for w, b in zip(weights, biases):
        O, Ci, KH, KW = w.shape
        assert Ci == C and KH == 1 and KW == 1
        w_list.append(w.reshape(O, C).astype(compute_dtype))
        b_list.append(b.reshape(O, 1).astype(jnp.float32))
        o_chs.append(O)

    in_specs = [pl.BlockSpec((C, ts), lambda r: (0, r))]
    in_specs += [pl.BlockSpec((O, C), lambda r: (0, 0)) for O in o_chs]
    in_specs += [pl.BlockSpec((O, 1), lambda r: (0, 0)) for O in o_chs]
    out_specs = [pl.BlockSpec((O, ts), lambda r: (0, r)) for O in o_chs]
    out_shape = [jax.ShapeDtypeStruct((O, P), out_dtype) for O in o_chs]

    flops = 2 * P * C * sum(o_chs)
    bytes_accessed = (x_flat.size * x_flat.dtype.itemsize
                      + sum(w.size * w.dtype.itemsize for w in w_list)
                      + sum(P * O * jnp.dtype(out_dtype).itemsize
                            for O in o_chs))

    outs = pl.pallas_call(
        functools.partial(_fused_1x1_relu_kernel, n_out=n_out),
        grid=(R,),
        in_specs=in_specs,
        out_specs=out_specs,
        out_shape=out_shape,
        compiler_params=pltpu.CompilerParams(
            dimension_semantics=("parallel",),
            vmem_limit_bytes=_VMEM_LIMIT),
        cost_estimate=pl.CostEstimate(flops=int(flops), transcendentals=0,
                                      bytes_accessed=int(bytes_accessed)),
    )(x_flat, *w_list, *b_list)
    return list(outs)


def conv2d_relu(x_cf, w, b, *, padding=0, out_tile=None,
                out_dtype=jnp.bfloat16, compute_dtype=jnp.bfloat16):
    """BasicConv2d (stride 1) in channel-first layout: (C,N,H,W) -> (O,N,H,W)."""
    C, N, H, W = x_cf.shape
    O, Ci, KH, KW = w.shape
    assert Ci == C
    if KH == 1 and KW == 1 and padding == 0:
        out = fused_1x1_convs_relu(x_cf.reshape(C, N * H * W), [w], [b],
                                   out_dtype=out_dtype,
                                   compute_dtype=compute_dtype)[0]
        return out.reshape(O, N, H, W)

    p = padding
    Hp, Wp = H + 2 * p, W + 2 * p
    # Single pad: zero spatial halo + one zero guard image appended on the
    # folded batch axis (covers the largest im2col tap offset).
    xp = jnp.pad(x_cf.astype(compute_dtype), ((0, 0), (0, 1), (p, p), (p, p)))
    L = (N + 1) * Hp * Wp
    M = N * Hp * Wp
    x_flat = xp.reshape(C, L)
    # Weight slab per kernel row dh, columns ordered (dw, c) to match the taps.
    wt = jnp.transpose(w, (2, 0, 3, 1)).reshape(KH, O, KW * C).astype(compute_dtype)
    bt = b.reshape(O, 1).astype(jnp.float32)

    to = _pick_out_tile(O, out_tile)
    G = O // to
    kern = functools.partial(_conv_relu_kernel, kh=KH, kw=KW, wp=Wp, m=M)

    out = pl.pallas_call(
        kern,
        grid=(G,),
        in_specs=[pl.BlockSpec((C, L), lambda g: (0, 0)),
                  pl.BlockSpec((KH, to, KW * C), lambda g: (0, g, 0)),
                  pl.BlockSpec((to, 1), lambda g: (g, 0))],
        out_specs=pl.BlockSpec((to, M), lambda g: (g, 0)),
        out_shape=jax.ShapeDtypeStruct((O, M), out_dtype),
        compiler_params=pltpu.CompilerParams(
            dimension_semantics=("parallel",),
            vmem_limit_bytes=_VMEM_LIMIT),
        cost_estimate=pl.CostEstimate(
            flops=int(2 * M * KH * KW * C * O), transcendentals=0,
            bytes_accessed=int(x_flat.size * x_flat.dtype.itemsize
                               + wt.size * wt.dtype.itemsize
                               + O * M * jnp.dtype(out_dtype).itemsize)),
    )(x_flat, wt, bt)
    # Strip per-sample padded (junk) rows/columns.
    return out.reshape(O, N, Hp, Wp)[:, :, :H, :W]


def maxpool3x3s1_conv1x1_relu(x_cf, w, b, *, out_tile=None,
                              out_dtype=jnp.bfloat16,
                              compute_dtype=jnp.bfloat16):
    """branch4: MaxPool2d(3, stride=1, padding=1) -> conv1x1 -> ReLU, fused."""
    C, N, H, W = x_cf.shape
    O, Ci, KH, KW = w.shape
    assert Ci == C and KH == 1 and KW == 1
    PK, p = 3, 1
    Hp, Wp = H + 2 * p, W + 2 * p

    xp = jnp.pad(x_cf.astype(compute_dtype), ((0, 0), (0, 1), (p, p), (p, p)),
                 constant_values=_POOL_PAD)
    L = (N + 1) * Hp * Wp
    M = N * Hp * Wp
    x_flat = xp.reshape(C, L)
    wt = w.reshape(O, C).astype(compute_dtype)
    bt = b.reshape(O, 1).astype(jnp.float32)

    to = _pick_out_tile(O, out_tile)
    G = O // to
    kern = functools.partial(_maxpool_conv1x1_relu_kernel, pk=PK, wp=Wp, m=M)

    out = pl.pallas_call(
        kern,
        grid=(G,),
        in_specs=[pl.BlockSpec((C, L), lambda g: (0, 0)),
                  pl.BlockSpec((to, C), lambda g: (g, 0)),
                  pl.BlockSpec((to, 1), lambda g: (g, 0))],
        out_specs=pl.BlockSpec((to, M), lambda g: (g, 0)),
        out_shape=jax.ShapeDtypeStruct((O, M), out_dtype),
        compiler_params=pltpu.CompilerParams(
            dimension_semantics=("parallel",),
            vmem_limit_bytes=_VMEM_LIMIT),
        cost_estimate=pl.CostEstimate(
            flops=int(2 * M * C * O), transcendentals=0,
            bytes_accessed=int(x_flat.size * x_flat.dtype.itemsize
                               + wt.size * wt.dtype.itemsize
                               + O * M * jnp.dtype(out_dtype).itemsize)),
    )(x_flat, wt, bt)
    return out.reshape(O, N, Hp, Wp)[:, :, :H, :W]


def inception_forward(x, params, *, lane_tile=None, out_tile=None,
                      compute_dtype=jnp.bfloat16, out_dtype=jnp.float32):
    """Inception.forward: 4 branches concatenated along channels (NCHW io)."""
    N, C, H, W = x.shape
    w1, c1 = params["branch1"]
    w2r, c2r = params["branch2_reduce"]
    w2, c2 = params["branch2"]
    w3r, c3r = params["branch3_reduce"]
    w3, c3 = params["branch3"]
    w4, c4 = params["branch4"]

    # Single NCHW -> channel-first transpose; everything downstream runs with
    # the batch folded into the lane dimension.
    x_cf = jnp.transpose(x.astype(compute_dtype), (1, 0, 2, 3))   # (C, N, H, W)

    # Stage 1: branch1 1x1 + both reduce 1x1 convs fused (x read once).
    b1, r2, r3 = fused_1x1_convs_relu(
        x_cf.reshape(C, N * H * W), [w1, w2r, w3r], [c1, c2r, c3r],
        out_dtype=compute_dtype, lane_tile=lane_tile,
        compute_dtype=compute_dtype)

    # Stage 2: spatial convs on the reduce outputs + fused pool/proj branch.
    b2 = conv2d_relu(r2.reshape(w2r.shape[0], N, H, W), w2, c2, padding=1,
                     out_tile=out_tile, out_dtype=compute_dtype,
                     compute_dtype=compute_dtype)
    b3 = conv2d_relu(r3.reshape(w3r.shape[0], N, H, W), w3, c3, padding=2,
                     out_tile=out_tile, out_dtype=compute_dtype,
                     compute_dtype=compute_dtype)
    b4 = maxpool3x3s1_conv1x1_relu(x_cf, w4, c4, out_tile=out_tile,
                                   out_dtype=compute_dtype,
                                   compute_dtype=compute_dtype)

    b1 = b1.reshape(w1.shape[0], N, H, W)
    out_cf = jnp.concatenate([b1, b2, b3, b4], axis=0)           # (Ctot,N,H,W)
    return jnp.transpose(out_cf, (1, 0, 2, 3)).astype(out_dtype)  # NCHW


# ---------------------------------------------------------------------------
# pure-JAX reference (mirrors the bf16-operand / f32-accumulation recipe)
# ---------------------------------------------------------------------------
def _ref_conv_relu(x, w, b, padding, compute_dtype=jnp.bfloat16):
    y = jax.lax.conv_general_dilated(
        x.astype(compute_dtype), w.astype(compute_dtype),
        window_strides=(1, 1),
        padding=[(padding, padding), (padding, padding)],
        dimension_numbers=("NCHW", "OIHW", "NCHW"),
        preferred_element_type=jnp.float32)
    return jnp.maximum(y + b.reshape(1, -1, 1, 1).astype(jnp.float32), 0.0)


def _ref_maxpool3x3(x):
    return jax.lax.reduce_window(
        x, -jnp.inf, jax.lax.max, (1, 1, 3, 3), (1, 1, 1, 1),
        [(0, 0), (0, 0), (1, 1), (1, 1)])


def _ref_inception(x, params, compute_dtype=jnp.bfloat16):
    w1, c1 = params["branch1"]
    w2r, c2r = params["branch2_reduce"]
    w2, c2 = params["branch2"]
    w3r, c3r = params["branch3_reduce"]
    w3, c3 = params["branch3"]
    w4, c4 = params["branch4"]
    b1 = _ref_conv_relu(x, w1, c1, 0, compute_dtype)
    r2 = _ref_conv_relu(x, w2r, c2r, 0, compute_dtype).astype(compute_dtype)
    b2 = _ref_conv_relu(r2, w2, c2, 1, compute_dtype)
    r3 = _ref_conv_relu(x, w3r, c3r, 0, compute_dtype).astype(compute_dtype)
    b3 = _ref_conv_relu(r3, w3, c3, 2, compute_dtype)
    b4 = _ref_conv_relu(_ref_maxpool3x3(x), w4, c4, 0, compute_dtype)
    return jnp.concatenate([b1, b2, b3, b4], axis=1)


# ---------------------------------------------------------------------------
# self-test
# ---------------------------------------------------------------------------
if __name__ == "__main__":
    key = jax.random.PRNGKey(0)
    keys = jax.random.split(key, 8)

    N, C, H, W = 2, 4, 16, 16
    ch1x1, ch3x3red, ch3x3, ch5x5red, ch5x5, pool_proj = 8, 8, 16, 8, 8, 8

    def conv_params(k, o, c, kh, kw):
        k1, k2 = jax.random.split(k)
        w = jax.random.normal(k1, (o, c, kh, kw), jnp.float32) * 0.1
        b = jax.random.normal(k2, (o,), jnp.float32) * 0.1
        return w, b

    params = {
        "branch1": conv_params(keys[0], ch1x1, C, 1, 1),
        "branch2_reduce": conv_params(keys[1], ch3x3red, C, 1, 1),
        "branch2": conv_params(keys[2], ch3x3, ch3x3red, 3, 3),
        "branch3_reduce": conv_params(keys[3], ch5x5red, C, 1, 1),
        "branch3": conv_params(keys[4], ch5x5, ch5x5red, 5, 5),
        "branch4": conv_params(keys[5], pool_proj, C, 1, 1),
    }
    x = jax.random.normal(keys[6], (N, C, H, W), jnp.float32)

    # Default (production) tile heuristics; the folded lane axis N*H*W = 512
    # is split into two 256-lane tiles, exercising the multi-step grid.
    fwd = jax.jit(inception_forward)
    out = jax.block_until_ready(fwd(x, params))

    ref = jax.block_until_ready(_ref_inception(x, params))

    assert out.shape == (N, ch1x1 + ch3x3 + ch5x5 + pool_proj, H, W), out.shape
    max_err = float(jnp.max(jnp.abs(out - ref)))
    assert jnp.allclose(out, ref, atol=1e-2, rtol=1e-2), max_err

    print("KERNEL_OK")
</pallas_src>

<mosaic_0001>
module attributes {stable_mosaic.version = 11 : i64} {
  func.func @_fused_1x1_relu_kernel(%arg0: i32, %arg1: memref<4x256xbf16, #tpu.memory_space<vmem>>, %arg2: memref<8x4xbf16, #tpu.memory_space<vmem>>, %arg3: memref<8x4xbf16, #tpu.memory_space<vmem>>, %arg4: memref<8x4xbf16, #tpu.memory_space<vmem>>, %arg5: memref<8x1xf32, #tpu.memory_space<vmem>>, %arg6: memref<8x1xf32, #tpu.memory_space<vmem>>, %arg7: memref<8x1xf32, #tpu.memory_space<vmem>>, %arg8: memref<8x256xbf16, #tpu.memory_space<vmem>>, %arg9: memref<8x256xbf16, #tpu.memory_space<vmem>>, %arg10: memref<8x256xbf16, #tpu.memory_space<vmem>>) attributes {dimension_semantics = [#tpu.dimension_semantics<parallel>], iteration_bounds = array<i64: 2>, scalar_prefetch = 0 : i64, scratch_operands = 0 : i64, tpu.core_type = #tpu.core_type<tc>, window_params = [{transform_indices = @transform_0, window_bounds = array<i64: 4, 256>}, {pipeline_mode = #tpu.pipeline_mode<synchronous>, transform_indices = @transform_1, window_bounds = array<i64: 8, 4>}, {pipeline_mode = #tpu.pipeline_mode<synchronous>, transform_indices = @transform_2, window_bounds = array<i64: 8, 4>}, {pipeline_mode = #tpu.pipeline_mode<synchronous>, transform_indices = @transform_3, window_bounds = array<i64: 8, 4>}, {pipeline_mode = #tpu.pipeline_mode<synchronous>, transform_indices = @transform_4, window_bounds = array<i64: 8, 1>}, {pipeline_mode = #tpu.pipeline_mode<synchronous>, transform_indices = @transform_5, window_bounds = array<i64: 8, 1>}, {pipeline_mode = #tpu.pipeline_mode<synchronous>, transform_indices = @transform_6, window_bounds = array<i64: 8, 1>}, {transform_indices = @transform_7, window_bounds = array<i64: 8, 256>}, {transform_indices = @transform_8, window_bounds = array<i64: 8, 256>}, {transform_indices = @transform_9, window_bounds = array<i64: 8, 256>}]} {
    %c0 = arith.constant 0 : index
    %c0_0 = arith.constant 0 : index
    %0 = vector.load %arg1[%c0, %c0_0] : memref<4x256xbf16, #tpu.memory_space<vmem>>, vector<4x256xbf16>
    %c0_1 = arith.constant 0 : index
    %c0_2 = arith.constant 0 : index
    %1 = vector.load %arg2[%c0_1, %c0_2] : memref<8x4xbf16, #tpu.memory_space<vmem>>, vector<8x4xbf16>
    %cst = arith.constant dense<0.000000e+00> : vector<8x256xf32>
    %2 = tpu.matmul %1, %0, %cst {dimension_numbers = #tpu.dot_dimension_numbers<[1], [0], [0], [1], [0, 0, 1, 1], [], []>} : vector<8x4xbf16>, vector<4x256xbf16>, vector<8x256xf32> -> vector<8x256xf32>
    %c0_3 = arith.constant 0 : index
    %c0_4 = arith.constant 0 : index
    %3 = vector.load %arg5[%c0_3, %c0_4] : memref<8x1xf32, #tpu.memory_space<vmem>>, vector<8x1xf32>
    %4 = vector.broadcast %3 : vector<8x1xf32> to vector<8x256xf32>
    %5 = arith.addf %2, %4 : vector<8x256xf32>
    %cst_5 = arith.constant 0.000000e+00 : f32
    %6 = vector.broadcast %cst_5 : f32 to vector<8x256xf32>
    %7 = arith.maximumf %5, %6 : vector<8x256xf32>
    %8 = arith.truncf %7 : vector<8x256xf32> to vector<8x256xbf16>
    %c0_6 = arith.constant 0 : index
    %c0_7 = arith.constant 0 : index
    %9 = vector.load %arg8[%c0_6, %c0_7] : memref<8x256xbf16, #tpu.memory_space<vmem>>, vector<8x256xbf16>
    tpu.vector_store %arg8[%c0_6, %c0_7], %8 {strides = array<i32>} : memref<8x256xbf16, #tpu.memory_space<vmem>>, vector<8x256xbf16>,
    %c0_8 = arith.constant 0 : index
    %c0_9 = arith.constant 0 : index
    %10 = vector.load %arg3[%c0_8, %c0_9] : memref<8x4xbf16, #tpu.memory_space<vmem>>, vector<8x4xbf16>
    %cst_10 = arith.constant dense<0.000000e+00> : vector<8x256xf32>
    %11 = tpu.matmul %10, %0, %cst_10 {dimension_numbers = #tpu.dot_dimension_numbers<[1], [0], [0], [1], [0, 0, 1, 1], [], []>} : vector<8x4xbf16>, vector<4x256xbf16>, vector<8x256xf32> -> vector<8x256xf32>
    %c0_11 = arith.constant 0 : index
    %c0_12 = arith.constant 0 : index
    %12 = vector.load %arg6[%c0_11, %c0_12] : memref<8x1xf32, #tpu.memory_space<vmem>>, vector<8x1xf32>
    %13 = vector.broadcast %12 : vector<8x1xf32> to vector<8x256xf32>
    %14 = arith.addf %11, %13 : vector<8x256xf32>
    %cst_13 = arith.constant 0.000000e+00 : f32
    %15 = vector.broadcast %cst_13 : f32 to vector<8x256xf32>
    %16 = arith.maximumf %14, %15 : vector<8x256xf32>
    %17 = arith.truncf %16 : vector<8x256xf32> to vector<8x256xbf16>
    %c0_14 = arith.constant 0 : index
    %c0_15 = arith.constant 0 : index
    %18 = vector.load %arg9[%c0_14, %c0_15] : memref<8x256xbf16, #tpu.memory_space<vmem>>, vector<8x256xbf16>
    tpu.vector_store %arg9[%c0_14, %c0_15], %17 {strides = array<i32>} : memref<8x256xbf16, #tpu.memory_space<vmem>>, vector<8x256xbf16>,
    %c0_16 = arith.constant 0 : index
    %c0_17 = arith.constant 0 : index
    %19 = vector.load %arg4[%c0_16, %c0_17] : memref<8x4xbf16, #tpu.memory_space<vmem>>, vector<8x4xbf16>
    %cst_18 = arith.constant dense<0.000000e+00> : vector<8x256xf32>
    %20 = tpu.matmul %19, %0, %cst_18 {dimension_numbers = #tpu.dot_dimension_numbers<[1], [0], [0], [1], [0, 0, 1, 1], [], []>} : vector<8x4xbf16>, vector<4x256xbf16>, vector<8x256xf32> -> vector<8x256xf32>
    %c0_19 = arith.constant 0 : index
    %c0_20 = arith.constant 0 : index
    %21 = vector.load %arg7[%c0_19, %c0_20] : memref<8x1xf32, #tpu.memory_space<vmem>>, vector<8x1xf32>
    %22 = vector.broadcast %21 : vector<8x1xf32> to vector<8x256xf32>
    %23 = arith.addf %20, %22 : vector<8x256xf32>
    %cst_21 = arith.constant 0.000000e+00 : f32
    %24 = vector.broadcast %cst_21 : f32 to vector<8x256xf32>
    %25 = arith.maximumf %23, %24 : vector<8x256xf32>
    %26 = arith.truncf %25 : vector<8x256xf32> to vector<8x256xbf16>
    %c0_22 = arith.constant 0 : index
    %c0_23 = arith.constant 0 : index
    %27 = vector.load %arg10[%c0_22, %c0_23] : memref<8x256xbf16, #tpu.memory_space<vmem>>, vector<8x256xbf16>
    tpu.vector_store %arg10[%c0_22, %c0_23], %26 {strides = array<i32>} : memref<8x256xbf16, #tpu.memory_space<vmem>>, vector<8x256xbf16>,
    return
  }
  func.func @transform_0(%arg0: i32) -> (i32, i32) {
    %c0_i32 = arith.constant 0 : i32
    %c0_i32_0 = arith.constant 0 : i32
    return %c0_i32, %arg0 : i32, i32
  }
  func.func @transform_1(%arg0: i32) -> (i32, i32) {
    %c0_i32 = arith.constant 0 : i32
    %c0_i32_0 = arith.constant 0 : i32
    %c0_i32_1 = arith.constant 0 : i32
    return %c0_i32, %c0_i32_0 : i32, i32
  }
  func.func @transform_2(%arg0: i32) -> (i32, i32) {
    %c0_i32 = arith.constant 0 : i32
    %c0_i32_0 = arith.constant 0 : i32
    %c0_i32_1 = arith.constant 0 : i32
    return %c0_i32, %c0_i32_0 : i32, i32
  }
  func.func @transform_3(%arg0: i32) -> (i32, i32) {
    %c0_i32 = arith.constant 0 : i32
    %c0_i32_0 = arith.constant 0 : i32
    %c0_i32_1 = arith.constant 0 : i32
    return %c0_i32, %c0_i32_0 : i32, i32
  }
  func.func @transform_4(%arg0: i32) -> (i32, i32) {
    %c0_i32 = arith.constant 0 : i32
    %c0_i32_0 = arith.constant 0 : i32
    %c0_i32_1 = arith.constant 0 : i32
    return %c0_i32, %c0_i32_0 : i32, i32
  }
  func.func @transform_5(%arg0: i32) -> (i32, i32) {
    %c0_i32 = arith.constant 0 : i32
    %c0_i32_0 = arith.constant 0 : i32
    %c0_i32_1 = arith.constant 0 : i32
    return %c0_i32, %c0_i32_0 : i32, i32
  }
  func.func @transform_6(%arg0: i32) -> (i32, i32) {
    %c0_i32 = arith.constant 0 : i32
    %c0_i32_0 = arith.constant 0 : i32
    %c0_i32_1 = arith.constant 0 : i32
    return %c0_i32, %c0_i32_0 : i32, i32
  }
  func.func @transform_7(%arg0: i32) -> (i32, i32) {
    %c0_i32 = arith.constant 0 : i32
    %c0_i32_0 = arith.constant 0 : i32
    return %c0_i32, %arg0 : i32, i32
  }
  func.func @transform_8(%arg0: i32) -> (i32, i32) {
    %c0_i32 = arith.constant 0 : i32
    %c0_i32_0 = arith.constant 0 : i32
    return %c0_i32, %arg0 : i32, i32
  }
  func.func @transform_9(%arg0: i32) -> (i32, i32) {
    %c0_i32 = arith.constant 0 : i32
    %c0_i32_0 = arith.constant 0 : i32
    return %c0_i32, %arg0 : i32, i32
  }
}

module attributes {stable_mosaic.version = 11 : i64} {
  func.func @_maxpool_conv1x1_relu_kernel(%arg0: i32, %arg1: memref<4x972xbf16, #tpu.memory_space<vmem>>, %arg2: memref<8x4xbf16, #tpu.memory_space<vmem>>, %arg3: memref<8x1xf32, #tpu.memory_space<vmem>>, %arg4: memref<8x648xbf16, #tpu.memory_space<vmem>>) attributes {dimension_semantics = [#tpu.dimension_semantics<parallel>], iteration_bounds = array<i64: 1>, scalar_prefetch = 0 : i64, scratch_operands = 0 : i64, tpu.core_type = #tpu.core_type<tc>, window_params = [{pipeline_mode = #tpu.pipeline_mode<synchronous>, transform_indices = @transform_0, window_bounds = array<i64: 4, 972>}, {transform_indices = @transform_1, window_bounds = array<i64: 8, 4>}, {transform_indices = @transform_2, window_bounds = array<i64: 8, 1>}, {transform_indices = @transform_3, window_bounds = array<i64: 8, 648>}]} {
    %c0 = arith.constant 0 : index
    %c0_0 = arith.constant 0 : index
    %0 = vector.load %arg1[%c0, %c0_0] : memref<4x972xbf16, #tpu.memory_space<vmem>>, vector<4x648xbf16>
    %c0_1 = arith.constant 0 : index
    %c1 = arith.constant 1 : index
    %1 = vector.load %arg1[%c0_1, %c1] : memref<4x972xbf16, #tpu.memory_space<vmem>>, vector<4x648xbf16>
    %2 = arith.maximumf %0, %1 : vector<4x648xbf16>
    %c0_2 = arith.constant 0 : index
    %c2 = arith.constant 2 : index
    %3 = vector.load %arg1[%c0_2, %c2] : memref<4x972xbf16, #tpu.memory_space<vmem>>, vector<4x648xbf16>
    %4 = arith.maximumf %2, %3 : vector<4x648xbf16>
    %c0_3 = arith.constant 0 : index
    %c18 = arith.constant 18 : index
    %5 = vector.load %arg1[%c0_3, %c18] : memref<4x972xbf16, #tpu.memory_space<vmem>>, vector<4x648xbf16>
    %6 = arith.maximumf %4, %5 : vector<4x648xbf16>
    %c0_4 = arith.constant 0 : index
    %c19 = arith.constant 19 : index
    %7 = vector.load %arg1[%c0_4, %c19] : memref<4x972xbf16, #tpu.memory_space<vmem>>, vector<4x648xbf16>
    %8 = arith.maximumf %6, %7 : vector<4x648xbf16>
    %c0_5 = arith.constant 0 : index
    %c20 = arith.constant 20 : index
    %9 = vector.load %arg1[%c0_5, %c20] : memref<4x972xbf16, #tpu.memory_space<vmem>>, vector<4x648xbf16>
    %10 = arith.maximumf %8, %9 : vector<4x648xbf16>
    %c0_6 = arith.constant 0 : index
    %c36 = arith.constant 36 : index
    %11 = vector.load %arg1[%c0_6, %c36] : memref<4x972xbf16, #tpu.memory_space<vmem>>, vector<4x648xbf16>
    %12 = arith.maximumf %10, %11 : vector<4x648xbf16>
    %c0_7 = arith.constant 0 : index
    %c37 = arith.constant 37 : index
    %13 = vector.load %arg1[%c0_7, %c37] : memref<4x972xbf16, #tpu.memory_space<vmem>>, vector<4x648xbf16>
    %14 = arith.maximumf %12, %13 : vector<4x648xbf16>
    %c0_8 = arith.constant 0 : index
    %c38 = arith.constant 38 : index
    %15 = vector.load %arg1[%c0_8, %c38] : memref<4x972xbf16, #tpu.memory_space<vmem>>, vector<4x648xbf16>
    %16 = arith.maximumf %14, %15 : vector<4x648xbf16>
    %c0_9 = arith.constant 0 : index
    %c0_10 = arith.constant 0 : index
    %17 = vector.load %arg2[%c0_9, %c0_10] : memref<8x4xbf16, #tpu.memory_space<vmem>>, vector<8x4xbf16>
    %cst = arith.constant dense<0.000000e+00> : vector<8x648xf32>
    %18 = tpu.matmul %17, %16, %cst {dimension_numbers = #tpu.dot_dimension_numbers<[1], [0], [0], [1], [0, 0, 1, 1], [], []>} : vector<8x4xbf16>, vector<4x648xbf16>, vector<8x648xf32> -> vector<8x648xf32>
    %c0_11 = arith.constant 0 : index
    %c0_12 = arith.constant 0 : index
    %19 = vector.load %arg3[%c0_11, %c0_12] : memref<8x1xf32, #tpu.memory_space<vmem>>, vector<8x1xf32>
    %20 = vector.broadcast %19 : vector<8x1xf32> to vector<8x648xf32>
    %21 = arith.addf %18, %20 : vector<8x648xf32>
    %cst_13 = arith.constant 0.000000e+00 : f32
    %22 = vector.broadcast %cst_13 : f32 to vector<8x648xf32>
    %23 = arith.maximumf %21, %22 : vector<8x648xf32>
    %24 = arith.truncf %23 : vector<8x648xf32> to vector<8x648xbf16>
    %c0_14 = arith.constant 0 : index
    %c0_15 = arith.constant 0 : index
    %25 = vector.load %arg4[%c0_14, %c0_15] : memref<8x648xbf16, #tpu.memory_space<vmem>>, vector<8x648xbf16>
    tpu.vector_store %arg4[%c0_14, %c0_15], %24 {strides = array<i32>} : memref<8x648xbf16, #tpu.memory_space<vmem>>, vector<8x648xbf16>,
    return
  }
  func.func @transform_0(%arg0: i32) -> (i32, i32) {
    %c0_i32 = arith.constant 0 : i32
    %c0_i32_0 = arith.constant 0 : i32
    %c0_i32_1 = arith.constant 0 : i32
    return %c0_i32, %c0_i32_0 : i32, i32
  }
  func.func @transform_1(%arg0: i32) -> (i32, i32) {
    %c0_i32 = arith.constant 0 : i32
    %c0_i32_0 = arith.constant 0 : i32
    return %arg0, %c0_i32 : i32, i32
  }
  func.func @transform_2(%arg0: i32) -> (i32, i32) {
    %c0_i32 = arith.constant 0 : i32
    %c0_i32_0 = arith.constant 0 : i32
    return %arg0, %c0_i32 : i32, i32
  }
  func.func @transform_3(%arg0: i32) -> (i32, i32) {
    %c0_i32 = arith.constant 0 : i32
    %c0_i32_0 = arith.constant 0 : i32
    return %arg0, %c0_i32 : i32, i32
  }
}

module attributes {stable_mosaic.version = 11 : i64} {
  func.func @_conv_relu_kernel(%arg0: i32, %arg1: memref<8x1200xbf16, #tpu.memory_space<vmem>>, %arg2: memref<5x8x40xbf16, #tpu.memory_space<vmem>>, %arg3: memref<8x1xf32, #tpu.memory_space<vmem>>, %arg4: memref<8x800xbf16, #tpu.memory_space<vmem>>) attributes {dimension_semantics = [#tpu.dimension_semantics<parallel>], iteration_bounds = array<i64: 1>, scalar_prefetch = 0 : i64, scratch_operands = 0 : i64, tpu.core_type = #tpu.core_type<tc>, window_params = [{pipeline_mode = #tpu.pipeline_mode<synchronous>, transform_indices = @transform_0, window_bounds = array<i64: 8, 1200>}, {transform_indices = @transform_1, window_bounds = array<i64: 5, 8, 40>}, {transform_indices = @transform_2, window_bounds = array<i64: 8, 1>}, {transform_indices = @transform_3, window_bounds = array<i64: 8, 800>}]} {
    %c0 = arith.constant 0 : index
    %c0_0 = arith.constant 0 : index
    %0 = vector.load %arg1[%c0, %c0_0] : memref<8x1200xbf16, #tpu.memory_space<vmem>>, vector<8x800xbf16>
    %c0_1 = arith.constant 0 : index
    %c1 = arith.constant 1 : index
    %1 = vector.load %arg1[%c0_1, %c1] : memref<8x1200xbf16, #tpu.memory_space<vmem>>, vector<8x800xbf16>
    %c0_2 = arith.constant 0 : index
    %c2 = arith.constant 2 : index
    %2 = vector.load %arg1[%c0_2, %c2] : memref<8x1200xbf16, #tpu.memory_space<vmem>>, vector<8x800xbf16>
    %c0_3 = arith.constant 0 : index
    %c3 = arith.constant 3 : index
    %3 = vector.load %arg1[%c0_3, %c3] : memref<8x1200xbf16, #tpu.memory_space<vmem>>, vector<8x800xbf16>
    %c0_4 = arith.constant 0 : index
    %c4 = arith.constant 4 : index
    %4 = vector.load %arg1[%c0_4, %c4] : memref<8x1200xbf16, #tpu.memory_space<vmem>>, vector<8x800xbf16>
    %5 = tpu.concatenate %0, %1, %2, %3, %4 in 0 : vector<8x800xbf16>, vector<8x800xbf16>, vector<8x800xbf16>, vector<8x800xbf16>, vector<8x800xbf16> -> vector<40x800xbf16>
    %c0_5 = arith.constant 0 : index
    %c0_6 = arith.constant 0 : index
    %c0_7 = arith.constant 0 : index
    %6 = vector.load %arg2[%c0_5, %c0_6, %c0_7] : memref<5x8x40xbf16, #tpu.memory_space<vmem>>, vector<1x8x40xbf16>
    %7 = vector.shape_cast %6 : vector<1x8x40xbf16> to vector<8x40xbf16>
    %cst = arith.constant dense<0.000000e+00> : vector<8x800xf32>
    %8 = tpu.matmul %7, %5, %cst {dimension_numbers = #tpu.dot_dimension_numbers<[1], [0], [0], [1], [0, 0, 1, 1], [], []>} : vector<8x40xbf16>, vector<40x800xbf16>, vector<8x800xf32> -> vector<8x800xf32>
    %c0_8 = arith.constant 0 : index
    %c20 = arith.constant 20 : index
    %9 = vector.load %arg1[%c0_8, %c20] : memref<8x1200xbf16, #tpu.memory_space<vmem>>, vector<8x800xbf16>
    %c0_9 = arith.constant 0 : index
    %c21 = arith.constant 21 : index
    %10 = vector.load %arg1[%c0_9, %c21] : memref<8x1200xbf16, #tpu.memory_space<vmem>>, vector<8x800xbf16>
    %c0_10 = arith.constant 0 : index
    %c22 = arith.constant 22 : index
    %11 = vector.load %arg1[%c0_10, %c22] : memref<8x1200xbf16, #tpu.memory_space<vmem>>, vector<8x800xbf16>
    %c0_11 = arith.constant 0 : index
    %c23 = arith.constant 23 : index
    %12 = vector.load %arg1[%c0_11, %c23] : memref<8x1200xbf16, #tpu.memory_space<vmem>>, vector<8x800xbf16>
    %c0_12 = arith.constant 0 : index
    %c24 = arith.constant 24 : index
    %13 = vector.load %arg1[%c0_12, %c24] : memref<8x1200xbf16, #tpu.memory_space<vmem>>, vector<8x800xbf16>
    %14 = tpu.concatenate %9, %10, %11, %12, %13 in 0 : vector<8x800xbf16>, vector<8x800xbf16>, vector<8x800xbf16>, vector<8x800xbf16>, vector<8x800xbf16> -> vector<40x800xbf16>
    %c1_13 = arith.constant 1 : index
    %c0_14 = arith.constant 0 : index
    %c0_15 = arith.constant 0 : index
    %15 = vector.load %arg2[%c1_13, %c0_14, %c0_15] : memref<5x8x40xbf16, #tpu.memory_space<vmem>>, vector<1x8x40xbf16>
    %16 = vector.shape_cast %15 : vector<1x8x40xbf16> to vector<8x40xbf16>
    %cst_16 = arith.constant dense<0.000000e+00> : vector<8x800xf32>
    %17 = tpu.matmul %16, %14, %cst_16 {dimension_numbers = #tpu.dot_dimension_numbers<[1], [0], [0], [1], [0, 0, 1, 1], [], []>} : vector<8x40xbf16>, vector<40x800xbf16>, vector<8x800xf32> -> vector<8x800xf32>
    %18 = arith.addf %8, %17 : vector<8x800xf32>
    %c0_17 = arith.constant 0 : index
    %c40 = arith.constant 40 : index
    %19 = vector.load %arg1[%c0_17, %c40] : memref<8x1200xbf16, #tpu.memory_space<vmem>>, vector<8x800xbf16>
    %c0_18 = arith.constant 0 : index
    %c41 = arith.constant 41 : index
    %20 = vector.load %arg1[%c0_18, %c41] : memref<8x1200xbf16, #tpu.memory_space<vmem>>, vector<8x800xbf16>
    %c0_19 = arith.constant 0 : index
    %c42 = arith.constant 42 : index
    %21 = vector.load %arg1[%c0_19, %c42] : memref<8x1200xbf16, #tpu.memory_space<vmem>>, vector<8x800xbf16>
    %c0_20 = arith.constant 0 : index
    %c43 = arith.constant 43 : index
    %22 = vector.load %arg1[%c0_20, %c43] : memref<8x1200xbf16, #tpu.memory_space<vmem>>, vector<8x800xbf16>
    %c0_21 = arith.constant 0 : index
    %c44 = arith.constant 44 : index
    %23 = vector.load %arg1[%c0_21, %c44] : memref<8x1200xbf16, #tpu.memory_space<vmem>>, vector<8x800xbf16>
    %24 = tpu.concatenate %19, %20, %21, %22, %23 in 0 : vector<8x800xbf16>, vector<8x800xbf16>, vector<8x800xbf16>, vector<8x800xbf16>, vector<8x800xbf16> -> vector<40x800xbf16>
    %c2_22 = arith.constant 2 : index
    %c0_23 = arith.constant 0 : index
    %c0_24 = arith.constant 0 : index
    %25 = vector.load %arg2[%c2_22, %c0_23, %c0_24] : memref<5x8x40xbf16, #tpu.memory_space<vmem>>, vector<1x8x40xbf16>
    %26 = vector.shape_cast %25 : vector<1x8x40xbf16> to vector<8x40xbf16>
    %cst_25 = arith.constant dense<0.000000e+00> : vector<8x800xf32>
    %27 = tpu.matmul %26, %24, %cst_25 {dimension_numbers = #tpu.dot_dimension_numbers<[1], [0], [0], [1], [0, 0, 1, 1], [], []>} : vector<8x40xbf16>, vector<40x800xbf16>, vector<8x800xf32> -> vector<8x800xf32>
    %28 = arith.addf %18, %27 : vector<8x800xf32>
    %c0_26 = arith.constant 0 : index
    %c60 = arith.constant 60 : index
    %29 = vector.load %arg1[%c0_26, %c60] : memref<8x1200xbf16, #tpu.memory_space<vmem>>, vector<8x800xbf16>
    %c0_27 = arith.constant 0 : index
    %c61 = arith.constant 61 : index
    %30 = vector.load %arg1[%c0_27, %c61] : memref<8x1200xbf16, #tpu.memory_space<vmem>>, vector<8x800xbf16>
    %c0_28 = arith.constant 0 : index
    %c62 = arith.constant 62 : index
    %31 = vector.load %arg1[%c0_28, %c62] : memref<8x1200xbf16, #tpu.memory_space<vmem>>, vector<8x800xbf16>
    %c0_29 = arith.constant 0 : index
    %c63 = arith.constant 63 : index
    %32 = vector.load %arg1[%c0_29, %c63] : memref<8x1200xbf16, #tpu.memory_space<vmem>>, vector<8x800xbf16>
    %c0_30 = arith.constant 0 : index
    %c64 = arith.constant 64 : index
    %33 = vector.load %arg1[%c0_30, %c64] : memref<8x1200xbf16, #tpu.memory_space<vmem>>, vector<8x800xbf16>
    %34 = tpu.concatenate %29, %30, %31, %32, %33 in 0 : vector<8x800xbf16>, vector<8x800xbf16>, vector<8x800xbf16>, vector<8x800xbf16>, vector<8x800xbf16> -> vector<40x800xbf16>
    %c3_31 = arith.constant 3 : index
    %c0_32 = arith.constant 0 : index
    %c0_33 = arith.constant 0 : index
    %35 = vector.load %arg2[%c3_31, %c0_32, %c0_33] : memref<5x8x40xbf16, #tpu.memory_space<vmem>>, vector<1x8x40xbf16>
    %36 = vector.shape_cast %35 : vector<1x8x40xbf16> to vector<8x40xbf16>
    %cst_34 = arith.constant dense<0.000000e+00> : vector<8x800xf32>
    %37 = tpu.matmul %36, %34, %cst_34 {dimension_numbers = #tpu.dot_dimension_numbers<[1], [0], [0], [1], [0, 0, 1, 1], [], []>} : vector<8x40xbf16>, vector<40x800xbf16>, vector<8x800xf32> -> vector<8x800xf32>
    %38 = arith.addf %28, %37 : vector<8x800xf32>
    %c0_35 = arith.constant 0 : index
    %c80 = arith.constant 80 : index
    %39 = vector.load %arg1[%c0_35, %c80] : memref<8x1200xbf16, #tpu.memory_space<vmem>>, vector<8x800xbf16>
    %c0_36 = arith.constant 0 : index
    %c81 = arith.constant 81 : index
    %40 = vector.load %arg1[%c0_36, %c81] : memref<8x1200xbf16, #tpu.memory_space<vmem>>, vector<8x800xbf16>
    %c0_37 = arith.constant 0 : index
    %c82 = arith.constant 82 : index
    %41 = vector.load %arg1[%c0_37, %c82] : memref<8x1200xbf16, #tpu.memory_space<vmem>>, vector<8x800xbf16>
    %c0_38 = arith.constant 0 : index
    %c83 = arith.constant 83 : index
    %42 = vector.load %arg1[%c0_38, %c83] : memref<8x1200xbf16, #tpu.memory_space<vmem>>, vector<8x800xbf16>
    %c0_39 = arith.constant 0 : index
    %c84 = arith.constant 84 : index
    %43 = vector.load %arg1[%c0_39, %c84] : memref<8x1200xbf16, #tpu.memory_space<vmem>>, vector<8x800xbf16>
    %44 = tpu.concatenate %39, %40, %41, %42, %43 in 0 : vector<8x800xbf16>, vector<8x800xbf16>, vector<8x800xbf16>, vector<8x800xbf16>, vector<8x800xbf16> -> vector<40x800xbf16>
    %c4_40 = arith.constant 4 : index
    %c0_41 = arith.constant 0 : index
    %c0_42 = arith.constant 0 : index
    %45 = vector.load %arg2[%c4_40, %c0_41, %c0_42] : memref<5x8x40xbf16, #tpu.memory_space<vmem>>, vector<1x8x40xbf16>
    %46 = vector.shape_cast %45 : vector<1x8x40xbf16> to vector<8x40xbf16>
    %cst_43 = arith.constant dense<0.000000e+00> : vector<8x800xf32>
    %47 = tpu.matmul %46, %44, %cst_43 {dimension_numbers = #tpu.dot_dimension_numbers<[1], [0], [0], [1], [0, 0, 1, 1], [], []>} : vector<8x40xbf16>, vector<40x800xbf16>, vector<8x800xf32> -> vector<8x800xf32>
    %48 = arith.addf %38, %47 : vector<8x800xf32>
    %c0_44 = arith.constant 0 : index
    %c0_45 = arith.constant 0 : index
    %49 = vector.load %arg3[%c0_44, %c0_45] : memref<8x1xf32, #tpu.memory_space<vmem>>, vector<8x1xf32>
    %50 = vector.broadcast %49 : vector<8x1xf32> to vector<8x800xf32>
    %51 = arith.addf %48, %50 : vector<8x800xf32>
    %cst_46 = arith.constant 0.000000e+00 : f32
    %52 = vector.broadcast %cst_46 : f32 to vector<8x800xf32>
    %53 = arith.maximumf %51, %52 : vector<8x800xf32>
    %54 = arith.truncf %53 : vector<8x800xf32> to vector<8x800xbf16>
    %c0_47 = arith.constant 0 : index
    %c0_48 = arith.constant 0 : index
    %55 = vector.load %arg4[%c0_47, %c0_48] : memref<8x800xbf16, #tpu.memory_space<vmem>>, vector<8x800xbf16>
    tpu.vector_store %arg4[%c0_47, %c0_48], %54 {strides = array<i32>} : memref<8x800xbf16, #tpu.memory_space<vmem>>, vector<8x800xbf16>,
    return
  }
  func.func @transform_0(%arg0: i32) -> (i32, i32) {
    %c0_i32 = arith.constant 0 : i32
    %c0_i32_0 = arith.constant 0 : i32
    %c0_i32_1 = arith.constant 0 : i32
    return %c0_i32, %c0_i32_0 : i32, i32
  }
  func.func @transform_1(%arg0: i32) -> (i32, i32, i32) {
    %c0_i32 = arith.constant 0 : i32
    %c0_i32_0 = arith.constant 0 : i32
    %c0_i32_1 = arith.constant 0 : i32
    return %c0_i32, %arg0, %c0_i32_0 : i32, i32, i32
  }
  func.func @transform_2(%arg0: i32) -> (i32, i32) {
    %c0_i32 = arith.constant 0 : i32
    %c0_i32_0 = arith.constant 0 : i32
    return %arg0, %c0_i32 : i32, i32
  }
  func.func @transform_3(%arg0: i32) -> (i32, i32) {
    %c0_i32 = arith.constant 0 : i32
    %c0_i32_0 = arith.constant 0 : i32
    return %arg0, %c0_i32 : i32, i32
  }
}

module attributes {stable_mosaic.version = 11 : i64} {
  func.func @_conv_relu_kernel(%arg0: i32, %arg1: memref<8x972xbf16, #tpu.memory_space<vmem>>, %arg2: memref<3x16x24xbf16, #tpu.memory_space<vmem>>, %arg3: memref<16x1xf32, #tpu.memory_space<vmem>>, %arg4: memref<16x648xbf16, #tpu.memory_space<vmem>>) attributes {dimension_semantics = [#tpu.dimension_semantics<parallel>], iteration_bounds = array<i64: 1>, scalar_prefetch = 0 : i64, scratch_operands = 0 : i64, tpu.core_type = #tpu.core_type<tc>, window_params = [{pipeline_mode = #tpu.pipeline_mode<synchronous>, transform_indices = @transform_0, window_bounds = array<i64: 8, 972>}, {transform_indices = @transform_1, window_bounds = array<i64: 3, 16, 24>}, {transform_indices = @transform_2, window_bounds = array<i64: 16, 1>}, {transform_indices = @transform_3, window_bounds = array<i64: 16, 648>}]} {
    %c0 = arith.constant 0 : index
    %c0_0 = arith.constant 0 : index
    %0 = vector.load %arg1[%c0, %c0_0] : memref<8x972xbf16, #tpu.memory_space<vmem>>, vector<8x648xbf16>
    %c0_1 = arith.constant 0 : index
    %c1 = arith.constant 1 : index
    %1 = vector.load %arg1[%c0_1, %c1] : memref<8x972xbf16, #tpu.memory_space<vmem>>, vector<8x648xbf16>
    %c0_2 = arith.constant 0 : index
    %c2 = arith.constant 2 : index
    %2 = vector.load %arg1[%c0_2, %c2] : memref<8x972xbf16, #tpu.memory_space<vmem>>, vector<8x648xbf16>
    %3 = tpu.concatenate %0, %1, %2 in 0 : vector<8x648xbf16>, vector<8x648xbf16>, vector<8x648xbf16> -> vector<24x648xbf16>
    %c0_3 = arith.constant 0 : index
    %c0_4 = arith.constant 0 : index
    %c0_5 = arith.constant 0 : index
    %4 = vector.load %arg2[%c0_3, %c0_4, %c0_5] : memref<3x16x24xbf16, #tpu.memory_space<vmem>>, vector<1x16x24xbf16>
    %5 = vector.shape_cast %4 : vector<1x16x24xbf16> to vector<16x24xbf16>
    %cst = arith.constant dense<0.000000e+00> : vector<16x648xf32>
    %6 = tpu.matmul %5, %3, %cst {dimension_numbers = #tpu.dot_dimension_numbers<[1], [0], [0], [1], [0, 0, 1, 1], [], []>} : vector<16x24xbf16>, vector<24x648xbf16>, vector<16x648xf32> -> vector<16x648xf32>
    %c0_6 = arith.constant 0 : index
    %c18 = arith.constant 18 : index
    %7 = vector.load %arg1[%c0_6, %c18] : memref<8x972xbf16, #tpu.memory_space<vmem>>, vector<8x648xbf16>
    %c0_7 = arith.constant 0 : index
    %c19 = arith.constant 19 : index
    %8 = vector.load %arg1[%c0_7, %c19] : memref<8x972xbf16, #tpu.memory_space<vmem>>, vector<8x648xbf16>
    %c0_8 = arith.constant 0 : index
    %c20 = arith.constant 20 : index
    %9 = vector.load %arg1[%c0_8, %c20] : memref<8x972xbf16, #tpu.memory_space<vmem>>, vector<8x648xbf16>
    %10 = tpu.concatenate %7, %8, %9 in 0 : vector<8x648xbf16>, vector<8x648xbf16>, vector<8x648xbf16> -> vector<24x648xbf16>
    %c1_9 = arith.constant 1 : index
    %c0_10 = arith.constant 0 : index
    %c0_11 = arith.constant 0 : index
    %11 = vector.load %arg2[%c1_9, %c0_10, %c0_11] : memref<3x16x24xbf16, #tpu.memory_space<vmem>>, vector<1x16x24xbf16>
    %12 = vector.shape_cast %11 : vector<1x16x24xbf16> to vector<16x24xbf16>
    %cst_12 = arith.constant dense<0.000000e+00> : vector<16x648xf32>
    %13 = tpu.matmul %12, %10, %cst_12 {dimension_numbers = #tpu.dot_dimension_numbers<[1], [0], [0], [1], [0, 0, 1, 1], [], []>} : vector<16x24xbf16>, vector<24x648xbf16>, vector<16x648xf32> -> vector<16x648xf32>
    %14 = arith.addf %6, %13 : vector<16x648xf32>
    %c0_13 = arith.constant 0 : index
    %c36 = arith.constant 36 : index
    %15 = vector.load %arg1[%c0_13, %c36] : memref<8x972xbf16, #tpu.memory_space<vmem>>, vector<8x648xbf16>
    %c0_14 = arith.constant 0 : index
    %c37 = arith.constant 37 : index
    %16 = vector.load %arg1[%c0_14, %c37] : memref<8x972xbf16, #tpu.memory_space<vmem>>, vector<8x648xbf16>
    %c0_15 = arith.constant 0 : index
    %c38 = arith.constant 38 : index
    %17 = vector.load %arg1[%c0_15, %c38] : memref<8x972xbf16, #tpu.memory_space<vmem>>, vector<8x648xbf16>
    %18 = tpu.concatenate %15, %16, %17 in 0 : vector<8x648xbf16>, vector<8x648xbf16>, vector<8x648xbf16> -> vector<24x648xbf16>
    %c2_16 = arith.constant 2 : index
    %c0_17 = arith.constant 0 : index
    %c0_18 = arith.constant 0 : index
    %19 = vector.load %arg2[%c2_16, %c0_17, %c0_18] : memref<3x16x24xbf16, #tpu.memory_space<vmem>>, vector<1x16x24xbf16>
    %20 = vector.shape_cast %19 : vector<1x16x24xbf16> to vector<16x24xbf16>
    %cst_19 = arith.constant dense<0.000000e+00> : vector<16x648xf32>
    %21 = tpu.matmul %20, %18, %cst_19 {dimension_numbers = #tpu.dot_dimension_numbers<[1], [0], [0], [1], [0, 0, 1, 1], [], []>} : vector<16x24xbf16>, vector<24x648xbf16>, vector<16x648xf32> -> vector<16x648xf32>
    %22 = arith.addf %14, %21 : vector<16x648xf32>
    %c0_20 = arith.constant 0 : index
    %c0_21 = arith.constant 0 : index
    %23 = vector.load %arg3[%c0_20, %c0_21] : memref<16x1xf32, #tpu.memory_space<vmem>>, vector<16x1xf32>
    %24 = vector.broadcast %23 : vector<16x1xf32> to vector<16x648xf32>
    %25 = arith.addf %22, %24 : vector<16x648xf32>
    %cst_22 = arith.constant 0.000000e+00 : f32
    %26 = vector.broadcast %cst_22 : f32 to vector<16x648xf32>
    %27 = arith.maximumf %25, %26 : vector<16x648xf32>
    %28 = arith.truncf %27 : vector<16x648xf32> to vector<16x648xbf16>
    %c0_23 = arith.constant 0 : index
    %c0_24 = arith.constant 0 : index
    %29 = vector.load %arg4[%c0_23, %c0_24] : memref<16x648xbf16, #tpu.memory_space<vmem>>, vector<16x648xbf16>
    tpu.vector_store %arg4[%c0_23, %c0_24], %28 {strides = array<i32>} : memref<16x648xbf16, #tpu.memory_space<vmem>>, vector<16x648xbf16>,
    return
  }
  func.func @transform_0(%arg0: i32) -> (i32, i32) {
    %c0_i32 = arith.constant 0 : i32
    %c0_i32_0 = arith.constant 0 : i32
    %c0_i32_1 = arith.constant 0 : i32
    return %c0_i32, %c0_i32_0 : i32, i32
  }
  func.func @transform_1(%arg0: i32) -> (i32, i32, i32) {
    %c0_i32 = arith.constant 0 : i32
    %c0_i32_0 = arith.constant 0 : i32
    %c0_i32_1 = arith.constant 0 : i32
    return %c0_i32, %arg0, %c0_i32_0 : i32, i32, i32
  }
  func.func @transform_2(%arg0: i32) -> (i32, i32) {
    %c0_i32 = arith.constant 0 : i32
    %c0_i32_0 = arith.constant 0 : i32
    return %arg0, %c0_i32 : i32, i32
  }
  func.func @transform_3(%arg0: i32) -> (i32, i32) {
    %c0_i32 = arith.constant 0 : i32
    %c0_i32_0 = arith.constant 0 : i32
    return %arg0, %c0_i32 : i32, i32
  }
}

</mosaic_0001>

<bundles_post_ra>
// kernel: inception_forward.4
= control target key start
LH: loop header
LB: loop body
LE: loop exit
PB: predicated region body
PF: predicated region fallthrough
CT: control target
= control target key end

     0   :  { %s790_s30 = smov 0   ;;  %s835_s0 = inlined_call_operand.vmem [shape: bf16[4,512], index: 0, kind: input, shape index: {}]   ;;  %s836_s1 = inlined_call_operand.vmem [shape: bf16[8,4], index: 1, kind: input, shape index: {}]   ;;  %s837_s2 = inlined_call_operand.vmem [shape: bf16[8,4], index: 2, kind: input, shape index: {}]   ;;  %s838_s3 = inlined_call_operand.vmem [shape: bf16[8,4], index: 3, kind: input, shape index: {}]   ;;  %s839_s4 = inlined_call_operand.vmem [shape: f32[8,1], index: 4, kind: input, shape index: {}]   ;;  %s840_s5 = inlined_call_operand.vmem [shape: f32[8,1], index: 5, kind: input, shape index: {}]   ;;  %s841_s6 = inlined_call_operand.vmem [shape: f32[8,1], index: 6, kind: input, shape index: {}]   ;;  %s842_s7 = inlined_call_operand.vmem [shape: bf16[8,512], index: 7, kind: output, shape index: {0}]   ;;  %s843_s8 = inlined_call_operand.vmem [shape: bf16[8,512], index: 8, kind: output, shape index: {1}]   ;;  %s844_s9 = inlined_call_operand.vmem [shape: bf16[8,512], index: 9, kind: output, shape index: {2}]  }
   0x1 LB: > { %s692_s10 = sadd.s32 4294967295, %s737_s30   ;;  %p696_p0 = scmp.ge.s32.totalorder %s737_s30, 1  ;;  %s737_s30 = sphi %s790_s30, %s20_s30  }
   0x2   : > { %p293_p1 = scmp.lt.s32.totalorder %s737_s30, 3 }
   0x4   : > { %p294_p2 = pnand %p696_p0, %p293_p1 }
   0x5   : > { %s697_s11 = sshll.u32 (!%p294_p2), %s692_s10, 1  ;;  %v739_v0 = vmov (!%p294_p2), 0   ;;  %v366_v1 = vld [vmem:[%s839_s4] sm:$0xff] (!%p294_p2)  ;;  %vm385_vm0 = vcmask (!%p294_p2), 1041408   ;;  %vm381_vm1 = vcmask (!%p294_p2), 31744  }
   0x6   : > { %297 = sbr.rel (%p294_p2) target bundleno = 251 (0xfb), region = 48  ;;  %p340_p3 = scmp.lt.s32.totalorder (!%p294_p2), %s697_s11, 3  ;;  %424 = vmatprep.mubr.bf16.mxu0 (!%p294_p2), %v739_v0  ;;  %486 = vmatprep.mubr.bf16.mxu1 (!%p294_p2), %v739_v0  ;;  %v507_v2 = vld [vmem:[%s841_s6] sm:$0xff] (!%p294_p2) }
   0x7   : > { %729 = vset.pattern.permute.xlu0 (!%p294_p2), %v739_v0  ;;  %730 = vset.pattern.permute.xlu1 (!%p294_p2), %v739_v0  ;;  %v445_v3 = vld [vmem:[%s840_s5] sm:$0xff] (!%p294_p2) }
   0x8   : > { %369 = vperm.xlu0 (!%p294_p2), %729, %v366_v1   ;;  %510 = vperm.xlu1 (!%p294_p2), %730, %v507_v2   ;;  %v365_v7 = vld [vmem:[%s836_s1] sm:$0xf] (!%p294_p2) }
   0x9   : > { %v444_v8 = vld [vmem:[%s837_s2] sm:$0xf] (!%p294_p2) }
   0xa   : > { %v506_v9 = vld [vmem:[%s838_s3] sm:$0xf] (!%p294_p2) }
   0xc   : > { %448 = vperm.xlu0 (!%p294_p2), %729, %v445_v3  }
   0xd   : > { %s846_s11 = smov (!%p340_p3, %s697_s11), 3 }
   0xe   : > { %s698_s18 = sshll.u32 %s846_s11, 1  ;;  %s700_s28 = sshll.u32 %s846_s11, 2 }
   0xf   : > { %s343_s21 = scalar_lea.vmem %s835_s0, %s698_s18  ;;  %s349_s12 = scalar_lea.vmem %s842_s7, %s700_s28 }
  0x10   : > { %v705_v4 = vld.sshfl [vmem:[%s343_s21] sm:$0x33 pattern:$0x76325410]  ;;  %s355_s15 = scalar_lea.vmem %s843_s8, %s700_s28  ;;  %s361_s17 = scalar_lea.vmem %s844_s9, %s700_s28 }
  0x11   : > { %v380_v5 = vcombine.high %v705_v4, %v705_v4  ;;  %v387_v6 = vsel %vm385_vm0, %v705_v4, 0 }
  0x13   : > { %706 = vmatprep.subr.msk.bf16.mxu0 %vm385_vm0, %v380_v5  ;;  %709 = vmatprep.subr.msk.bf16.mxu1 %vm385_vm0, %v380_v5 }
  0x14   : > { %393 = vmatpush1.bf16.msra.mxu0 %v387_v6  ;;  %455 = vmatpush1.bf16.msra.mxu1 %v387_v6 }
  0x15   : > { %712 = vmatprep.subr.msk.bf16.mxu0 %vm385_vm0, %v380_v5 }
  0x17   : > { %707 = vmatmul.mubr.msk.bf16.vlgmr.msra.gmra.mrb[0].mxu0 %vm381_vm1, %v365_v7  ;;  %710 = vmatmul.mubr.msk.bf16.vlgmr.msra.gmra.mrb[0].mxu1 %vm381_vm1, %v444_v8 }
  0x18   : > { %517 = vmatpush1.bf16.msra.mxu0 %v387_v6  ;;  %548 = vmatprep.mubr.bf16.mxu0 %v739_v0 }
  0x1f   : > { %713 = vmatmul.mubr.msk.bf16.vlgmr.msra.gmra.mrb[4].mxu0 %vm381_vm1, %v506_v9 }
  0x87   : > { %v370_v10 = vpop.permute.xlu0 %369  ;;  %v511_v30 = vpop.permute.xlu1 %510 }
  0x8b   : > { %v449_v11 = vpop.permute.xlu0 %448 }
  0xea   : > { %v426_v12 = vpop.f32.mrb[0].mxu0  ;;  %v488_v13 = vpop.f32.mrb[0].mxu1 }
  0xeb   : > { %v427_v14 = vadd.f32 %v426_v12, %v370_v10  ;;  %v428_v15 = vpop.f32.mrb[1].mxu0  ;;  %v489_v16 = vadd.f32 %v488_v13, %v449_v11  ;;  %v490_v17 = vpop.f32.mrb[1].mxu1 }
  0xec   : > { %v429_v18 = vadd.f32 %v428_v15, %v370_v10  ;;  %v430_v19 = vpop.f32.mrb[2].mxu0  ;;  %v491_v20 = vadd.f32 %v490_v17, %v449_v11  ;;  %v492_v21 = vpop.f32.mrb[2].mxu1 }
  0xed   : > { %v433_v22 = vmax.f32 %v427_v14, 0.0  ;;  %v431_v23 = vpop.f32.mrb[3].mxu0  ;;  %v495_v24 = vmax.f32 %v489_v16, 0.0  ;;  %v493_v25 = vpop.f32.mrb[3].mxu1 }
  0xee   : > { %v434_v26 = vmax.f32 %v429_v18, 0.0  ;;  %v496_v27 = vmax.f32 %v491_v20, 0.0 }
  0xf0   : > { %v717_v28 = vpack.c.bf16 %v434_v26, %v433_v22  ;;  %v718_v29 = vpack.c.bf16 %v496_v27, %v495_v24 }
  0xf2   : > { %443 = vst [vmem:[%s349_s12] sm:$0xff] %v717_v28  ;;  %505 = vst [vmem:[%s355_s15] sm:$0xff] %v718_v29  ;;  %v550_v31 = vpop.f32.mrb[4].mxu0 }
  0xf3   : > { %v551_v32 = vadd.f32 %v550_v31, %v511_v30  ;;  %v552_v33 = vpop.f32.mrb[5].mxu0 }
  0xf4   : > { %v553_v34 = vadd.f32 %v552_v33, %v511_v30  ;;  %v554_v35 = vpop.f32.mrb[6].mxu0 }
  0xf5   : > { %v557_v36 = vmax.f32 %v551_v32, 0.0  ;;  %v555_v37 = vpop.f32.mrb[7].mxu0 }
  0xf6   : > { %v558_v38 = vmax.f32 %v553_v34, 0.0 }
  0xf8   : > { %v719_v39 = vpack.c.bf16 %v558_v38, %v557_v36 }
  0xfa   : > { %567 = vst [vmem:[%s361_s17] sm:$0xff] %v719_v39 }
  0xfb PF: > { %s20_s30 = sadd.s32 1, %s737_s30  }
  0xfc   : > { %p17_p4 = scmp.ge.s32.totalorder %s20_s30, 4  }
  0xfe   :  { %19 = sbr.rel (!%p17_p4) target bundleno = 1 (0x1), region = 102 }

// kernel: inception_forward.7
= control target key start
LH: loop header
LB: loop body
LE: loop exit
PB: predicated region body
PF: predicated region fallthrough
CT: control target
= control target key end

     0   :  { %s375_s14 = smov 126   ;;  %s376_s15 = smov 127   ;;  %v383_v2 = vmov 0   ;;  %vm25_vm0 = vcmask 1045504   ;;  %vm27_vm1 = vcmask 1039360   ;;  %vm41_vm2 = vcmask 1031168   ;;  %s459_s0 = inlined_call_operand.vmem [shape: bf16[4,972], index: 0, kind: input, shape index: {}]   ;;  %s460_s2 = inlined_call_operand.vmem [shape: f32[8,1], index: 2, kind: input, shape index: {}]   ;;  %s461_s1 = inlined_call_operand.vmem [shape: bf16[8,4], index: 1, kind: input, shape index: {}]   ;;  %s462_s3 = inlined_call_operand.vmem [shape: bf16[8,648], index: 3, kind: output, shape index: {}]  }
   0x1   :  { %v408_v0 = vld [vmem:[%s459_s0] sm:$0xff]  ;;  %v16_v1 = vld [vmem:[%s459_s0 + $0x8] sm:$0xf]  ;;  %s377_s18 = smov 110   ;;  %s378_s19 = smov 109   ;;  %221 = vmatprep.mubr.bf16.mxu0 %v383_v2  ;;  %262 = vmatprep.mubr.bf16.mxu1 %v383_v2  ;;  %vm55_vm3 = vcmask 900096   ;;  %v145_v51 = vlaneseq }
   0x2   :  { %34 = vrot.lane.b32.xlu1 %v408_v0, %s375_s14  ;;  %19 = vrot.lane.b32.xlu0 %v408_v0, %s376_s15  ;;  %s379_s20 = smov 108   ;;  %s380_s21 = smov 92   ;;  %v133_v3 = vld [vmem:[%s460_s2] sm:$0xff]  ;;  %vm69_vm4 = vcmask 891904   ;;  %vm83_vm5 = vcmask 883712   ;;  %vm97_vm6 = vcmask 752640  }
   0x3   :  { %s381_s22 = smov 91   ;;  %s382_s0 = smov 90   ;;  %374 = vset.pattern.permute.xlu0 %v383_v2  ;;  %v384_v46 = vmov 1983009808   ;;  %vm111_vm7 = vcmask 744448   ;;  %vm125_vm8 = vcmask 736256  }
   0x4   :  { %v143_v47 = vunpack.c.l.s4 %v384_v46  ;;  %vm170_vm9 = vcmask 1041408   ;;  %vm166_vm10 = vcmask 31744   ;;  %vm344_vm11 = vcmask 1043456  }
   0x5   :  { %vm345_vm12 = vcmask 64516  }
   0x6   :  { %36 = vrot.lane.b32.xlu1 %v16_v1, %s375_s14  ;;  %21 = vrot.lane.b32.xlu0 %v16_v1, %s376_s15  ;;  %v144_v62 = vunpack.c.0.s8 %v143_v47  ;;  %vm346_vm13 = vmor %vm345_vm12, %vm344_vm11 }
   0xa   :  { %50 = vrot.lane.b32.xlu1 %v16_v1, %s377_s18  ;;  %48 = vrot.lane.b32.xlu0 %v408_v0, %s377_s18 }
   0xe   :  { %64 = vrot.lane.b32.xlu1 %v16_v1, %s378_s19  ;;  %62 = vrot.lane.b32.xlu0 %v408_v0, %s378_s19 }
  0x12   :  { %78 = vrot.lane.b32.xlu1 %v16_v1, %s379_s20  ;;  %76 = vrot.lane.b32.xlu0 %v408_v0, %s379_s20 }
  0x16   :  { %92 = vrot.lane.b32.xlu1 %v16_v1, %s380_s21  ;;  %90 = vrot.lane.b32.xlu0 %v408_v0, %s380_s21 }
  0x1a   :  { %106 = vrot.lane.b32.xlu1 %v16_v1, %s381_s22  ;;  %104 = vrot.lane.b32.xlu0 %v408_v0, %s381_s22 }
  0x1e   :  { %120 = vrot.lane.b32.xlu1 %v16_v1, %s382_s0  ;;  %118 = vrot.lane.b32.xlu0 %v408_v0, %s382_s0 }
  0x22   :  { %136 = vperm.xlu0 %374, %v133_v3   ;;  %v146_v3 = vshrl.u32 %v145_v51, 7 }
  0x74   :  { %v35_v4 = vpop.permute.xlu1 %34  ;;  %v20_v5 = vpop.permute.xlu0 %19 }
  0x75   :  { %v23_v9 = vrot.slane %v20_v5, 2  ;;  %v38_v18 = vrot.slane %v35_v4, 2 }
  0x78   :  { %v37_v6 = vpop.permute.xlu1 %36  ;;  %v22_v7 = vpop.permute.xlu0 %21 }
  0x79   :  { %v24_v8 = vrot.slane %v22_v7, 2  ;;  %v39_v13 = vrot.slane %v37_v6, 2 }
  0x7b   :  { %v26_v12 = vsel %vm25_vm0, %v23_v9, %v24_v8  ;;  %v29_v14 = vsel %vm27_vm1, %v22_v7, %v24_v8  ;;  %v40_v22 = vsel %vm25_vm0, %v38_v18, %v39_v13  ;;  %v43_v28 = vsel %vm41_vm2, %v37_v6, %v39_v13 }
  0x7c   :  { %v51_v10 = vpop.permute.xlu1 %50  ;;  %v49_v11 = vpop.permute.xlu0 %48  ;;  %v28_v15 = vsel %vm27_vm1, %v20_v5, %v26_v12  ;;  %v33_v21 = vmax.bf16 %v29_v14, %v16_v1  ;;  %v42_v33 = vsel %vm41_vm2, %v35_v4, %v40_v22  ;;  %v147_v13 = vsub.s32 %v144_v62, %v146_v3 }
  0x7d   :  { %v53_v19 = vrot.slane %v51_v10, 2  ;;  %v52_v20 = vrot.slane %v49_v11, 2  ;;  %v32_v23 = vmax.bf16 %v28_v15, %v408_v0 }
  0x7e   :  { %v47_v32 = vmax.bf16 %v43_v28, %v33_v21 }
  0x7f   :  { %v54_v29 = vsel %vm25_vm0, %v52_v20, %v53_v19  ;;  %v57_v34 = vsel %vm55_vm3, %v51_v10, %v53_v19  ;;  %v46_v35 = vmax.bf16 %v42_v33, %v32_v23 }
  0x80   :  { %v65_v16 = vpop.permute.xlu1 %64  ;;  %v63_v17 = vpop.permute.xlu0 %62  ;;  %v56_v37 = vsel %vm55_vm3, %v49_v11, %v54_v29  ;;  %v61_v44 = vmax.bf16 %v57_v34, %v47_v32 }
  0x81   :  { %v67_v24 = vrot.slane %v65_v16, 2  ;;  %v66_v25 = vrot.slane %v63_v17, 2  ;;  %v60_v48 = vmax.bf16 %v56_v37, %v46_v35 }
  0x83   :  { %v68_v36 = vsel %vm25_vm0, %v66_v25, %v67_v24  ;;  %v71_v40 = vsel %vm69_vm4, %v65_v16, %v67_v24 }
  0x84   :  { %v79_v26 = vpop.permute.xlu1 %78  ;;  %v77_v27 = vpop.permute.xlu0 %76  ;;  %v70_v45 = vsel %vm69_vm4, %v63_v17, %v68_v36  ;;  %v75_v52 = vmax.bf16 %v71_v40, %v61_v44 }
  0x85   :  { %v81_v30 = vrot.slane %v79_v26, 2  ;;  %v80_v31 = vrot.slane %v77_v27, 2  ;;  %v74_v56 = vmax.bf16 %v70_v45, %v60_v48 }
  0x87   :  { %v82_v41 = vsel %vm25_vm0, %v80_v31, %v81_v30  ;;  %v85_v49 = vsel %vm83_vm5, %v79_v26, %v81_v30 }
  0x88   :  { %v93_v38 = vpop.permute.xlu1 %92  ;;  %v91_v39 = vpop.permute.xlu0 %90  ;;  %v84_v53 = vsel %vm83_vm5, %v77_v27, %v82_v41  ;;  %v89_v60 = vmax.bf16 %v85_v49, %v75_v52  ;;  %v132_v27 = vld [vmem:[%s461_s1] sm:$0xf] }
  0x89   :  { %v95_v42 = vrot.slane %v93_v38, 2  ;;  %v94_v43 = vrot.slane %v91_v39, 2  ;;  %v88_v63 = vmax.bf16 %v84_v53, %v74_v56 }
  0x8b   :  { %v96_v50 = vsel %vm25_vm0, %v94_v43, %v95_v42  ;;  %v99_v57 = vsel %vm97_vm6, %v93_v38, %v95_v42 }
  0x8c   :  { %v107_v54 = vpop.permute.xlu1 %106  ;;  %v105_v55 = vpop.permute.xlu0 %104  ;;  %v98_v61 = vsel %vm97_vm6, %v91_v39, %v96_v50  ;;  %v103_v4 = vmax.bf16 %v99_v57, %v89_v60 }
  0x8d   :  { %v109_v58 = vrot.slane %v107_v54, 2  ;;  %v108_v59 = vrot.slane %v105_v55, 2  ;;  %v102_v8 = vmax.bf16 %v98_v61, %v88_v63 }
  0x8f   :  { %v113_v0 = vsel %vm111_vm7, %v107_v54, %v109_v58  ;;  %v110_v1 = vsel %vm25_vm0, %v108_v59, %v109_v58 }
  0x90   :  { %v112_v5 = vsel %vm111_vm7, %v105_v55, %v110_v1  ;;  %v121_v6 = vpop.permute.xlu1 %120  ;;  %v119_v7 = vpop.permute.xlu0 %118  ;;  %v117_v11 = vmax.bf16 %v113_v0, %v103_v4 }
  0x91   :  { %v123_v9 = vrot.slane %v121_v6, 2  ;;  %v122_v10 = vrot.slane %v119_v7, 2  ;;  %v116_v12 = vmax.bf16 %v112_v5, %v102_v8 }
  0x93   :  { %v127_v14 = vsel %vm125_vm8, %v121_v6, %v123_v9  ;;  %v124_v15 = vsel %vm25_vm0, %v122_v10, %v123_v9 }
  0x94   :  { %v131_v16 = vmax.bf16 %v127_v14, %v117_v11  ;;  %v126_v17 = vsel %vm125_vm8, %v119_v7, %v124_v15 }
  0x95   :  { %v130_v18 = vmax.bf16 %v126_v17, %v116_v12 }
  0x96   :  { %v164_v19 = vrot.slane %v131_v16, %v147_v13 }
  0x97   :  { %v141_v20 = vcombine.high %v130_v18, %v130_v18  ;;  %v148_v21 = vrot.slane %v130_v18, %v147_v13 }
  0x98   :  { %v165_v24 = vcombine.high %v164_v19, %v164_v19  ;;  %v184_v29 = vsel %vm170_vm9, %v164_v19, 0 }
  0x99   :  { %v156_v22 = vcombine.high %v148_v21, %v148_v21  ;;  %v155_v23 = vrot.slane %v141_v20, %v147_v13  ;;  %v172_v25 = vsel %vm170_vm9, %v148_v21, 0 }
  0x9b   :  { %352 = vmatprep.subr.msk.bf16.mxu0 %vm170_vm9, %v156_v22  ;;  %v157_v26 = vcombine.high %v155_v23, %v155_v23  ;;  %v178_v28 = vsel %vm170_vm9, %v155_v23, 0 }
  0x9c   :  { %190 = vmatpush1.bf16.msra.mxu0 %v172_v25 }
  0x9d   :  { %354 = vmatprep.subr.msk.bf16.mxu1 %vm170_vm9, %v157_v26  ;;  %356 = vmatprep.subr.msk.bf16.mxu0 %vm170_vm9, %v165_v24 }
  0x9e   :  { %231 = vmatpush1.bf16.msra.mxu1 %v178_v28 }
  0x9f   :  { %353 = vmatmul.mubr.msk.bf16.vlgmr.msra.gmra.mrb[0].mxu0 %vm166_vm10, %v132_v27 }
  0xa0   :  { %272 = vmatpush1.bf16.msra.mxu0 %v184_v29  ;;  %303 = vmatprep.mubr.bf16.mxu0 %v383_v2 }
  0xa1   :  { %355 = vmatmul.mubr.msk.bf16.vlgmr.msra.gmra.mrb[0].mxu1 %vm166_vm10, %v132_v27  ;;  %v137_v30 = vpop.permute.xlu0 %136 }
  0xa7   :  { %357 = vmatmul.mubr.msk.bf16.vlgmr.msra.gmra.mrb[4].mxu0 %vm166_vm10, %v132_v27 }
 0x172   :  { %v223_v31 = vpop.f32.mrb[0].mxu0 }
 0x173   :  { %v225_v32 = vpop.f32.mrb[1].mxu0  ;;  %v224_v33 = vadd.f32 %v223_v31, %v137_v30 }
 0x174   :  { %v226_v34 = vadd.f32 %v225_v32, %v137_v30  ;;  %v227_v35 = vpop.f32.mrb[2].mxu0  ;;  %v264_v36 = vpop.f32.mrb[0].mxu1 }
 0x175   :  { %v312_v37 = vmax.f32 %v224_v33, 0.0  ;;  %v228_v38 = vpop.f32.mrb[3].mxu0  ;;  %v265_v39 = vadd.f32 %v264_v36, %v137_v30  ;;  %v266_v40 = vpop.f32.mrb[1].mxu1 }
 0x176   :  { %v313_v41 = vmax.f32 %v226_v34, 0.0  ;;  %v267_v42 = vadd.f32 %v266_v40, %v137_v30  ;;  %v268_v43 = vpop.f32.mrb[2].mxu1 }
 0x177   :  { %v314_v44 = vmax.f32 %v265_v39, 0.0  ;;  %v269_v45 = vpop.f32.mrb[3].mxu1 }
 0x178   :  { %v361_v46 = vpack.c.bf16 %v313_v41, %v312_v37  ;;  %v315_v2 = vmax.f32 %v267_v42, 0.0 }
 0x17a   :  { %v362_v47 = vpack.c.bf16 %v315_v2, %v314_v44  ;;  %342 = vst [vmem:[%s462_s3] sm:$0xff] %v361_v46  ;;  %v305_v48 = vpop.f32.mrb[4].mxu0 }
 0x17b   :  { %v306_v49 = vadd.f32 %v305_v48, %v137_v30  ;;  %v307_v50 = vpop.f32.mrb[5].mxu0 }
 0x17c   :  { %343 = vst [vmem:[%s462_s3 + $0x8] sm:$0xff] %v362_v47  ;;  %v308_v51 = vadd.f32 %v307_v50, %v137_v30  ;;  %v309_v52 = vpop.f32.mrb[6].mxu0 }
 0x17d   :  { %v316_v53 = vmax.f32 %v306_v49, 0.0  ;;  %v310_v54 = vpop.f32.mrb[7].mxu0 }
 0x17e   :  { %v317_v55 = vmax.f32 %v308_v51, 0.0 }
 0x180   :  { %v363_v56 = vpack.c.bf16 %v317_v55, %v316_v53 }
 0x182   :  { %347 = vst.msk [vmem:[%s462_s3 + $0x10] sm:$0xff] %vm346_vm13, %v363_v56 }

// kernel: inception_forward.6
= control target key start
LH: loop header
LB: loop body
LE: loop exit
PB: predicated region body
PF: predicated region fallthrough
CT: control target
= control target key end

     0   :  { %s1659_s16 = smov 127   ;;  %s1660_s19 = smov 126   ;;  %vm114_vm0 = vcmask 1014784   ;;  %vm51_vm1 = vcmask 1039360   ;;  %vm121_vm2 = vcmask 1043456   ;;  %vm93_vm3 = vcmask 1022976   ;;  %s2413_s0 = inlined_call_operand.vmem [shape: bf16[8,1200], index: 0, kind: input, shape index: {}]   ;;  %s2414_s1 = inlined_call_operand.vmem [shape: bf16[5,8,40], index: 1, kind: input, shape index: {}]   ;;  %s2415_s2 = inlined_call_operand.vmem [shape: f32[8,1], index: 2, kind: input, shape index: {}]   ;;  %s2416_s3 = inlined_call_operand.vmem [shape: bf16[8,800], index: 3, kind: output, shape index: {}]  }
   0x1   :  { %v16_v0 = vld [vmem:[%s2413_s0 + $0x8] sm:$0xff]  ;;  %v15_v1 = vld [vmem:[%s2413_s0] sm:$0xff]  ;;  %v17_v6 = vld [vmem:[%s2413_s0 + $0x10] sm:$0xff]  ;;  %s1661_s20 = smov 125   ;;  %s1662_s21 = smov 124   ;;  %vm72_vm4 = vcmask 1031168  }
   0x2   :  { %v1696_v2 = vcombine.high %v16_v0, %v16_v0  ;;  %v1698_v3 = vcombine.high %v15_v1, %v15_v1  ;;  %v1704_v4 = vcombine.low %v16_v0, %v16_v0  ;;  %v1706_v5 = vcombine.low %v15_v1, %v15_v1  ;;  %v1658_v9 = vld [vmem:[%s2413_s0 + $0x18] ss:$0 sps:$4 sm:$0xff]   ;;  %s1663_s0 = smov 108   ;;  %s1664_s24 = smov 88  }
   0x3   :  { %v1715_v7 = vcombine.low %v17_v6, %v17_v6  ;;  %v1717_v8 = vcombine.high %v17_v6, %v17_v6  ;;  %s1666_s25 = smov 68   ;;  %s1667_s26 = smov 48   ;;  %vm689_vm5 = vcmask 719872   ;;  %vm237_vm6 = vcmask 883712  }
   0x4   :  { %43 = vrot.lane.b32.xlu1 %v1696_v2, %s1659_s16  ;;  %39 = vrot.lane.b32.xlu0 %v1698_v3, %s1659_s16  ;;  %vm270_vm7 = vcmask 326656   ;;  %vm1669_vm8 = vmmov 0   ;;  %vm960_vm9 = vcmask 556032   ;;  %vm1231_vm10 = vcmask 392192  }
   0x5   :  { %vm1510_vm11 = vcmask 257024  }
   0x8   :  { %41 = vrot.lane.b32.xlu0 %v1704_v4, %s1659_s16  ;;  %37 = vrot.lane.b32.xlu1 %v1706_v5, %s1659_s16 }
   0xc   :  { %45 = vrot.lane.b32.xlu0 %v1715_v7, %s1659_s16  ;;  %47 = vrot.lane.b32.xlu1 %v1717_v8, %s1659_s16 }
  0x10   :  { %60 = vrot.lane.b32.xlu0 %v1698_v3, %s1660_s19  ;;  %62 = vrot.lane.b32.xlu1 %v1704_v4, %s1660_s19 }
  0x14   :  { %64 = vrot.lane.b32.xlu0 %v1696_v2, %s1660_s19  ;;  %81 = vrot.lane.b32.xlu1 %v1698_v3, %s1661_s20 }
  0x18   :  { %83 = vrot.lane.b32.xlu0 %v1704_v4, %s1661_s20  ;;  %85 = vrot.lane.b32.xlu1 %v1696_v2, %s1661_s20 }
  0x1c   :  { %58 = vrot.lane.b32.xlu0 %v1706_v5, %s1660_s19  ;;  %66 = vrot.lane.b32.xlu1 %v1715_v7, %s1660_s19 }
  0x20   :  { %68 = vrot.lane.b32.xlu0 %v1717_v8, %s1660_s19  ;;  %79 = vrot.lane.b32.xlu1 %v1706_v5, %s1661_s20 }
  0x24   :  { %87 = vrot.lane.b32.xlu0 %v1715_v7, %s1661_s20  ;;  %89 = vrot.lane.b32.xlu1 %v1717_v8, %s1661_s20 }
  0x28   :  { %100 = vrot.lane.b32.xlu0 %v1706_v5, %s1662_s21  ;;  %102 = vrot.lane.b32.xlu1 %v1698_v3, %s1662_s21 }
  0x2c   :  { %104 = vrot.lane.b32.xlu0 %v1704_v4, %s1662_s21  ;;  %106 = vrot.lane.b32.xlu1 %v1696_v2, %s1662_s21 }
  0x30   :  { %108 = vrot.lane.b32.xlu0 %v1715_v7, %s1662_s21  ;;  %110 = vrot.lane.b32.xlu1 %v1717_v8, %s1662_s21 }
  0x34   :  { %49 = vrot.lane.b32.xlu0 %v1658_v9, %s1659_s16  ;;  %70 = vrot.lane.b32.xlu1 %v1658_v9, %s1660_s19 }
  0x38   :  { %91 = vrot.lane.b32.xlu0 %v1658_v9, %s1661_s20  ;;  %112 = vrot.lane.b32.xlu1 %v1658_v9, %s1662_s21 }
  0x76   :  { %v44_v10 = vpop.permute.xlu1 %43  ;;  %v1745_v11 = vpop.permute.xlu0 %39 }
  0x7a   :  { %v1747_v12 = vpop.permute.xlu0 %41  ;;  %v1749_v13 = vpop.permute.xlu1 %37 }
  0x7b   :  { %v54_v41 = vsel %vm51_vm1, %v1747_v12, %v44_v10  ;;  %v53_v55 = vsel %vm51_vm1, %v1745_v11, %v1747_v12  ;;  %v52_v60 = vsel %vm51_vm1, %v1749_v13, %v1745_v11 }
  0x7c   :  { %v1814_v44 = vsel %vm121_vm2, %v1704_v4, %v54_v41  ;;  %v1865_v59 = vsel %vm121_vm2, %v1698_v3, %v53_v55  ;;  %v1881_v63 = vsel %vm121_vm2, %v1706_v5, %v52_v60 }
  0x7e   :  { %v1751_v14 = vpop.permute.xlu0 %45  ;;  %v1753_v15 = vpop.permute.xlu1 %47 }
  0x7f   :  { %v55_v45 = vsel %vm51_vm1, %v44_v10, %v1751_v14  ;;  %v56_v0 = vsel %vm51_vm1, %v1751_v14, %v1753_v15 }
  0x80   :  { %v1827_v48 = vsel %vm121_vm2, %v1696_v2, %v55_v45  ;;  %v1900_v4 = vsel %vm121_vm2, %v1715_v7, %v56_v0 }
  0x82   :  { %v61_v16 = vpop.permute.xlu0 %60  ;;  %v1755_v17 = vpop.permute.xlu1 %62 }
  0x83   :  { %v74_v50 = vsel %vm72_vm4, %v61_v16, %v1755_v17 }
  0x86   :  { %v1757_v18 = vpop.permute.xlu0 %64  ;;  %v82_v19 = vpop.permute.xlu1 %81 }
  0x87   :  { %v75_v7 = vsel %vm72_vm4, %v1755_v17, %v1757_v18 }
  0x8a   :  { %v1759_v20 = vpop.permute.xlu0 %83  ;;  %v1761_v21 = vpop.permute.xlu1 %85 }
  0x8b   :  { %v95_v49 = vsel %vm93_vm3, %v82_v19, %v1759_v20  ;;  %v96_v5 = vsel %vm93_vm3, %v1759_v20, %v1761_v21 }
  0x8c   :  { %v1841_v52 = vsel %vm121_vm2, %v74_v50, %v95_v49 }
  0x8e   :  { %v59_v22 = vpop.permute.xlu0 %58  ;;  %v1763_v23 = vpop.permute.xlu1 %66 }
  0x8f   :  { %v73_v54 = vsel %vm72_vm4, %v59_v22, %v61_v16  ;;  %v76_v11 = vsel %vm72_vm4, %v1757_v18, %v1763_v23 }
  0x92   :  { %v1765_v24 = vpop.permute.xlu0 %68  ;;  %v80_v25 = vpop.permute.xlu1 %79 }
  0x93   :  { %v94_v53 = vsel %vm93_vm3, %v80_v25, %v82_v19  ;;  %v77_v58 = vsel %vm72_vm4, %v1763_v23, %v1765_v24 }
  0x94   :  { %v1851_v56 = vsel %vm121_vm2, %v73_v54, %v94_v53 }
  0x96   :  { %v1767_v26 = vpop.permute.xlu0 %87  ;;  %v1769_v27 = vpop.permute.xlu1 %89 }
  0x97   :  { %v98_v57 = vsel %vm93_vm3, %v1767_v26, %v1769_v27  ;;  %v97_v10 = vsel %vm93_vm3, %v1761_v21, %v1767_v26 }
  0x98   :  { %v1871_v61 = vsel %vm121_vm2, %v77_v58, %v98_v57  ;;  %v1932_v12 = vsel %vm121_vm2, %v76_v11, %v97_v10 }
  0x9a   :  { %v101_v28 = vpop.permute.xlu0 %100  ;;  %v103_v29 = vpop.permute.xlu1 %102 }
  0x9b   :  { %v1792_v39 = vsel %vm114_vm0, %v101_v28, %v103_v29 }
  0x9e   :  { %v105_v30 = vpop.permute.xlu0 %104  ;;  %v107_v31 = vpop.permute.xlu1 %106 }
  0x9f   :  { %v1772_v32 = vsel %vm114_vm0, %v103_v29, %v105_v30  ;;  %v1799_v40 = vsel %vm114_vm0, %v105_v30, %v107_v31 }
  0xa0   :  { %225 = vrot.lane.b32.xlu1 %v1772_v32, %s1663_s0 }
  0xa2   :  { %v109_v33 = vpop.permute.xlu0 %108  ;;  %v111_v34 = vpop.permute.xlu1 %110 }
  0xa3   :  { %v1777_v35 = vsel %vm114_vm0, %v107_v31, %v109_v33  ;;  %v1808_v43 = vsel %vm114_vm0, %v109_v33, %v111_v34 }
  0xa4   :  { %229 = vrot.lane.b32.xlu1 %v1777_v35, %s1663_s0 }
  0xa6   :  { %v71_v36 = vpop.permute.xlu1 %70  ;;  %v50_v42 = vpop.permute.xlu0 %49 }
  0xa7   :  { %v1819_v46 = vsel %vm121_vm2, %v1658_v9, %v50_v42  ;;  %v57_v62 = vsel %vm51_vm1, %v1753_v15, %v50_v42  ;;  %v78_v3 = vsel %vm72_vm4, %v1765_v24, %v71_v36  ;;  %v1919_v9 = vsel %vm121_vm2, %v75_v7, %v96_v5 }
  0xa8   :  { %v1888_v1 = vsel %vm121_vm2, %v1717_v8, %v57_v62  ;;  %v1665_v8 = vmov 0  }
  0xa9   :  { %327 = vmatprep.mubr.bf16.mxu0 %v1665_v8  ;;  %368 = vmatprep.mubr.bf16.mxu1 %v1665_v8 }
  0xaa   :  { %v1781_v37 = vpop.permute.xlu1 %112  ;;  %v92_v47 = vpop.permute.xlu0 %91  ;;  %1651 = vset.pattern.permute.xlu0 %v1665_v8 }
  0xab   :  { %235 = vrot.lane.b32.xlu0 %v1781_v37, %s1663_s0  ;;  %v1787_v38 = vsel %vm114_vm0, %v111_v34, %v1781_v37  ;;  %v1836_v51 = vsel %vm121_vm2, %v71_v36, %v92_v47  ;;  %v99_v2 = vsel %vm93_vm3, %v1769_v27, %v92_v47 }
  0xac   :  { %233 = vrot.lane.b32.xlu1 %v1787_v38, %s1663_s0  ;;  %v1906_v6 = vsel %vm121_vm2, %v78_v3, %v99_v2 }
  0xaf   :  { %223 = vrot.lane.b32.xlu0 %v1792_v39, %s1663_s0 }
  0xb0   :  { %675 = vrot.lane.b32.xlu1 %v1792_v39, %s1664_s24 }
  0xb3   :  { %227 = vrot.lane.b32.xlu0 %v1799_v40, %s1663_s0 }
  0xb4   :  { %679 = vrot.lane.b32.xlu1 %v1799_v40, %s1664_s24 }
  0xb7   :  { %231 = vrot.lane.b32.xlu0 %v1808_v43, %s1663_s0 }
  0xb8   :  { %199 = vrot.lane.b32.xlu1 %v1814_v44, %s1663_s0 }
  0xbb   :  { %207 = vrot.lane.b32.xlu0 %v1819_v46, %s1663_s0 }
  0xbc   :  { %201 = vrot.lane.b32.xlu1 %v1827_v48, %s1663_s0 }
  0xbf   :  { %221 = vrot.lane.b32.xlu0 %v1836_v51, %s1663_s0 }
  0xc0   :  { %211 = vrot.lane.b32.xlu1 %v1841_v52, %s1663_s0 }
  0xc3   :  { %677 = vrot.lane.b32.xlu0 %v1772_v32, %s1664_s24 }
  0xc4   :  { %209 = vrot.lane.b32.xlu1 %v1851_v56, %s1663_s0 }
  0xc7   :  { %197 = vrot.lane.b32.xlu0 %v1865_v59, %s1663_s0 }
  0xc8   :  { %217 = vrot.lane.b32.xlu1 %v1871_v61, %s1663_s0 }
  0xcb   :  { %195 = vrot.lane.b32.xlu0 %v1881_v63, %s1663_s0 }
  0xcc   :  { %205 = vrot.lane.b32.xlu1 %v1888_v1, %s1663_s0 }
  0xcf   :  { %203 = vrot.lane.b32.xlu0 %v1900_v4, %s1663_s0 }
  0xd0   :  { %219 = vrot.lane.b32.xlu1 %v1906_v6, %s1663_s0 }
  0xd3   :  { %213 = vrot.lane.b32.xlu0 %v1919_v9, %s1663_s0 }
  0xd4   :  { %649 = vrot.lane.b32.xlu1 %v1865_v59, %s1664_s24 }
  0xd7   :  { %215 = vrot.lane.b32.xlu0 %v1932_v12, %s1663_s0 }
  0xd8   :  { %647 = vrot.lane.b32.xlu1 %v1881_v63, %s1664_s24 }
  0xdb   :  { %651 = vrot.lane.b32.xlu0 %v1814_v44, %s1664_s24 }
  0xdc   :  { %655 = vrot.lane.b32.xlu1 %v1900_v4, %s1664_s24 }
  0xdf   :  { %653 = vrot.lane.b32.xlu0 %v1827_v48, %s1664_s24 }
  0xe0   :  { %665 = vrot.lane.b32.xlu1 %v1919_v9, %s1664_s24 }
  0xe3   :  { %663 = vrot.lane.b32.xlu0 %v1841_v52, %s1664_s24 }
  0xe4   :  { %667 = vrot.lane.b32.xlu1 %v1932_v12, %s1664_s24 }
  0xe7   :  { %661 = vrot.lane.b32.xlu0 %v1851_v56, %s1664_s24 }
  0xe8   :  { %683 = vrot.lane.b32.xlu1 %v1808_v43, %s1664_s24 }
  0xeb   :  { %669 = vrot.lane.b32.xlu0 %v1871_v61, %s1664_s24 }
  0xec   :  { %659 = vrot.lane.b32.xlu1 %v1819_v46, %s1664_s24 }
  0xef   :  { %681 = vrot.lane.b32.xlu0 %v1777_v35, %s1664_s24 }
  0xf0   :  { %673 = vrot.lane.b32.xlu1 %v1836_v51, %s1664_s24 }
  0xf3   :  { %657 = vrot.lane.b32.xlu0 %v1888_v1, %s1664_s24 }
  0xf4   :  { %687 = vrot.lane.b32.xlu1 %v1781_v37, %s1664_s24 }
  0xf7   :  { %671 = vrot.lane.b32.xlu0 %v1906_v6, %s1664_s24 }
  0xf8   :  { %922 = vrot.lane.b32.xlu1 %v1814_v44, %s1666_s25 }
  0xfb   :  { %685 = vrot.lane.b32.xlu0 %v1787_v38, %s1664_s24 }
  0xfc   :  { %924 = vrot.lane.b32.xlu1 %v1827_v48, %s1666_s25 }
  0xff   :  { %920 = vrot.lane.b32.xlu0 %v1865_v59, %s1666_s25 }
 0x100   :  { %934 = vrot.lane.b32.xlu1 %v1841_v52, %s1666_s25 }
 0x103   :  { %918 = vrot.lane.b32.xlu0 %v1881_v63, %s1666_s25 }
 0x104   :  { %932 = vrot.lane.b32.xlu1 %v1851_v56, %s1666_s25 }
 0x107   :  { %926 = vrot.lane.b32.xlu0 %v1900_v4, %s1666_s25 }
 0x108   :  { %940 = vrot.lane.b32.xlu1 %v1871_v61, %s1666_s25 }
 0x10b   :  { %936 = vrot.lane.b32.xlu0 %v1919_v9, %s1666_s25 }
 0x10c   :  { %948 = vrot.lane.b32.xlu1 %v1772_v32, %s1666_s25 }
 0x10f   :  { %938 = vrot.lane.b32.xlu0 %v1932_v12, %s1666_s25 }
 0x110   :  { %952 = vrot.lane.b32.xlu1 %v1777_v35, %s1666_s25 }
 0x112   :  { %v1996_v13 = vpop.permute.xlu1 %225 }
 0x113   :  { %946 = vrot.lane.b32.xlu0 %v1792_v39, %s1666_s25 }
 0x114   :  { %928 = vrot.lane.b32.xlu1 %v1888_v1, %s1666_s25 }
 0x116   :  { %v2004_v14 = vpop.permute.xlu1 %229 }
 0x117   :  { %950 = vrot.lane.b32.xlu0 %v1799_v40, %s1666_s25 }
 0x118   :  { %942 = vrot.lane.b32.xlu1 %v1906_v6, %s1666_s25 }
 0x11b   :  { %954 = vrot.lane.b32.xlu0 %v1808_v43, %s1666_s25 }
 0x11c   :  { %956 = vrot.lane.b32.xlu1 %v1787_v38, %s1666_s25 }
 0x11d   :  { %v2010_v15 = vpop.permute.xlu0 %235 }
 0x11e   :  { %v2012_v16 = vpop.permute.xlu1 %233 }
 0x11f   :  { %930 = vrot.lane.b32.xlu0 %v1819_v46, %s1666_s25 }
 0x120   :  { %1191 = vrot.lane.b32.xlu1 %v1865_v59, %s1667_s26 }
 0x121   :  { %v224_v17 = vpop.permute.xlu0 %223 }
 0x122   :  { %v676_v18 = vpop.permute.xlu1 %675  ;;  %v250_v58 = vsel %vm237_vm6, %v224_v17, %v1996_v13 }
 0x123   :  { %944 = vrot.lane.b32.xlu0 %v1836_v51, %s1666_s25  ;;  %v275_v5 = vsel %vm121_vm2, %v250_v58, 0 }
 0x124   :  { %1189 = vrot.lane.b32.xlu1 %v1881_v63, %s1667_s26 }
 0x125   :  { %v2022_v19 = vpop.permute.xlu0 %227 }
 0x126   :  { %v2024_v20 = vpop.permute.xlu1 %679  ;;  %v251_v60 = vsel %vm237_vm6, %v1996_v13, %v2022_v19  ;;  %v252_v7 = vsel %vm237_vm6, %v2022_v19, %v2004_v14  ;;  %v1523_v13 = vld [vmem:[%s2414_s1 + $0x4] sm:$0xf] }
 0x127   :  { %958 = vrot.lane.b32.xlu0 %v1781_v37, %s1666_s25 }
 0x128   :  { %1197 = vrot.lane.b32.xlu1 %v1900_v4, %s1667_s26 }
 0x129   :  { %v2030_v21 = vpop.permute.xlu0 %231 }
 0x12a   :  { %v200_v22 = vpop.permute.xlu1 %199  ;;  %v253_v10 = vsel %vm237_vm6, %v2004_v14, %v2030_v21  ;;  %v281_v14 = vsel %vm121_vm2, %v252_v7, 0 }
 0x12b   :  { %1193 = vrot.lane.b32.xlu0 %v1814_v44, %s1667_s26 }
 0x12c   :  { %1207 = vrot.lane.b32.xlu1 %v1919_v9, %s1667_s26 }
 0x12d   :  { %v2036_v23 = vpop.permute.xlu0 %207 }
 0x12e   :  { %v202_v24 = vpop.permute.xlu1 %201 }
 0x12f   :  { %1195 = vrot.lane.b32.xlu0 %v1827_v48, %s1667_s26  ;;  %v240_v50 = vsel %vm237_vm6, %v200_v22, %v202_v24 }
 0x130   :  { %1209 = vrot.lane.b32.xlu1 %v1932_v12, %s1667_s26 }
 0x131   :  { %v2042_v25 = vpop.permute.xlu0 %221 }
 0x132   :  { %v212_v26 = vpop.permute.xlu1 %211 }
 0x133   :  { %1205 = vrot.lane.b32.xlu0 %v1841_v52, %s1667_s26 }
 0x134   :  { %1217 = vrot.lane.b32.xlu1 %v1792_v39, %s1667_s26 }
 0x135   :  { %v678_v27 = vpop.permute.xlu0 %677 }
 0x136   :  { %v2049_v28 = vsel %vm689_vm5, %v676_v18, %v678_v27  ;;  %v2053_v29 = vsel %vm689_vm5, %v678_v27, %v2024_v20  ;;  %v210_v30 = vpop.permute.xlu1 %209  ;;  %v1668_v27 = vmov 0.0  }
 0x137   :  { %1203 = vrot.lane.b32.xlu0 %v1851_v56, %s1667_s26  ;;  %v244_v57 = vsel %vm237_vm6, %v210_v30, %v212_v26 }
 0x138   :  { %1221 = vrot.lane.b32.xlu1 %v1799_v40, %s1667_s26 }
 0x139   :  { %v198_v31 = vpop.permute.xlu0 %197 }
 0x13a   :  { %v2059_v33 = vpop.permute.xlu1 %217  ;;  %v239_v34 = vsel %vm237_vm6, %v198_v31, %v200_v22 }
 0x13b   :  { %1211 = vrot.lane.b32.xlu0 %v1871_v61, %s1667_s26  ;;  %295 = vmatprep.subr.bf16.mxu0 %v239_v34  ;;  %v255_v34 = vsel %vm237_vm6, %v2012_v16, %v2010_v15 }
 0x13c   :  { %1225 = vrot.lane.b32.xlu1 %v1808_v43, %s1667_s26 }
 0x13d   :  { %v196_v36 = vpop.permute.xlu0 %195 }
 0x13e   :  { %v206_v41 = vpop.permute.xlu1 %205  ;;  %v238_v42 = vsel %vm237_vm6, %v196_v36, %v198_v31  ;;  %v254_v36 = vsel %vm237_vm6, %v2030_v21, %v2012_v16 }
 0x13f   :  { %1219 = vrot.lane.b32.xlu0 %v1772_v32, %s1667_s26  ;;  %296 = vmatpush1.bf16.msra.mxu0 %v238_v42  ;;  %v243_v11 = vsel %vm237_vm6, %v206_v41, %v2036_v23  ;;  %v287_v42 = vsel %vm121_vm2, %v254_v36, 0 }
 0x140   :  { %1201 = vrot.lane.b32.xlu1 %v1819_v46, %s1667_s26 }
 0x141   :  { %v204_v45 = vpop.permute.xlu0 %203 }
 0x142   :  { %v220_v47 = vpop.permute.xlu1 %219  ;;  %v241_v49 = vsel %vm237_vm6, %v202_v24, %v204_v45  ;;  %v242_v19 = vsel %vm237_vm6, %v204_v45, %v206_v41  ;;  %v1458_v24 = vld [vmem:[%s2415_s2] sm:$0xff] }
 0x143   :  { %1223 = vrot.lane.b32.xlu0 %v1777_v35, %s1667_s26  ;;  %336 = vmatprep.subr.bf16.mxu1 %v241_v49  ;;  %v249_v22 = vsel %vm237_vm6, %v220_v47, %v2042_v25  ;;  %v248_v31 = vsel %vm237_vm6, %v2059_v33, %v220_v47 }
 0x144   :  { %1215 = vrot.lane.b32.xlu1 %v1836_v51, %s1667_s26  ;;  %337 = vmatpush1.bf16.msra.mxu1 %v240_v50 }
 0x145   :  { %v214_v53 = vpop.permute.xlu0 %213 }
 0x146   :  { %v2077_v54 = vpop.permute.xlu1 %649  ;;  %v245_v55 = vsel %vm237_vm6, %v212_v26, %v214_v53 }
 0x147   :  { %1199 = vrot.lane.b32.xlu0 %v1888_v1, %s1667_s26  ;;  %297 = vmatprep.subr.bf16.mxu0 %v245_v55 }
 0x148   :  { %1229 = vrot.lane.b32.xlu1 %v1781_v37, %s1667_s26  ;;  %298 = vmatpush1.bf16.msra.mxu0 %v244_v57 }
 0x149   :  { %1524 = vmatprep.subr.msk.bf16.mxu0 %vm121_vm2, %v251_v60  ;;  %v216_v62 = vpop.permute.xlu0 %215 }
 0x14a   :  { %v2091_v0 = vpop.permute.xlu1 %647  ;;  %v247_v2 = vsel %vm237_vm6, %v216_v62, %v2059_v33  ;;  %v246_v3 = vsel %vm237_vm6, %v214_v53, %v216_v62 }
 0x14b   :  { %1213 = vrot.lane.b32.xlu0 %v1906_v6, %s1667_s26  ;;  %338 = vmatprep.subr.bf16.mxu1 %v247_v2 }
 0x14c   :  { %300 = vmatpush1.bf16.msra.mxu0 %v275_v5  ;;  %339 = vmatpush1.bf16.msra.mxu1 %v246_v3 }
 0x14d   :  { %1526 = vmatprep.subr.msk.bf16.mxu1 %vm121_vm2, %v253_v10  ;;  %377 = vmatprep.subr.bf16.mxu0 %v243_v11  ;;  %v2111_v17 = vpop.permute.xlu0 %651 }
 0x14e   :  { %v2113_v18 = vpop.permute.xlu1 %655 }
 0x14f   :  { %1227 = vrot.lane.b32.xlu0 %v1787_v38, %s1667_s26  ;;  %1525 = vmatmul.mubr.msk.bf16.vlgmr.msra.gmra.mrb[0].mxu0 %vm270_vm7, %v1523_v13 }
 0x150   :  { %341 = vmatpush1.bf16.msra.mxu1 %v281_v14  ;;  %378 = vmatpush1.bf16.msra.mxu0 %v242_v19 }
 0x151   :  { %379 = vmatprep.subr.bf16.mxu0 %v249_v22  ;;  %v2125_v26 = vpop.permute.xlu0 %653  ;;  %1590 = vmatprep.subr.bf16.mxu1 %v1668_v27 }
 0x152   :  { %v2128_v30 = vpop.permute.xlu1 %665  ;;  %409 = vmatprep.mubr.bf16.mxu0 %v1665_v8 }
 0x153   :  { %1527 = vmatmul.mubr.msk.bf16.vlgmr.msra.gmra.mrb[0].mxu1 %vm270_vm7, %v1523_v13  ;;  %1461 = vperm.xlu0 %1651, %v1458_v24  }
 0x154   :  { %380 = vmatpush1.bf16.msra.mxu0 %v248_v31  ;;  %1591 = vmatpush3.bf16.msra.mxu1 %v2036_v23  ;;  %v293_v23 = vsel %vm121_vm2, %v2010_v15, 0 }
 0x155   :  { %1528 = vmatprep.subr.msk.bf16.mxu0 %vm121_vm2, %v255_v34  ;;  %v2142_v41 = vpop.permute.xlu0 %663  ;;  %1592 = vmatprep.subr.bf16.mxu1 %v1668_v27 }
 0x156   :  { %v2145_v33 = vpop.permute.xlu1 %667  ;;  %1596 = vmatprep.mubr.msk.bf16.mxu1 %vm1669_vm8, %v1668_v27 }
 0x157   :  { %v698_v55 = vsel %vm689_vm5, %v2128_v30, %v2145_v33 }
 0x158   :  { %382 = vmatpush1.bf16.msra.mxu0 %v287_v42  ;;  %1593 = vmatpush3.bf16.msra.mxu1 %v2042_v25 }
 0x159   :  { %482 = vmatprep.subr.bf16.mxu0 %v1865_v59  ;;  %v2152_v16 = vpop.permute.xlu0 %661  ;;  %1594 = vmatprep.subr.bf16.mxu1 %v1668_v27 }
 0x15a   :  { %v2155_v21 = vpop.permute.xlu1 %683  ;;  %v696_v47 = vsel %vm689_vm5, %v2152_v16, %v2142_v41 }
 0x15b   :  { %1529 = vmatmul.mubr.msk.bf16.vlgmr.msra.gmra.mrb[4].mxu0 %vm270_vm7, %v1523_v13 }
 0x15c   :  { %1595 = vmatpush3.bf16.msra.mxu1 %v293_v23  ;;  %483 = vmatpush1.bf16.msra.mxu0 %v1881_v63  ;;  %v462_v63 = vsel %vm121_vm2, %v1792_v39, 0  ;;  %v468_v39 = vsel %vm121_vm2, %v1799_v40, 0 }
 0x15d   :  { %484 = vmatprep.subr.bf16.mxu0 %v1841_v52  ;;  %523 = vmatprep.subr.bf16.mxu1 %v1827_v48  ;;  %v2163_v25 = vpop.permute.xlu0 %669 }
 0x15e   :  { %v2165_v59 = vpop.permute.xlu1 %659  ;;  %514 = vmatprep.mubr.bf16.mxu0 %v1665_v8  ;;  %v699_v49 = vsel %vm689_vm5, %v2145_v33, %v2163_v25 }
 0x15f   :  { %1597 = vmatmul.mubr.msk.bf16.vlgmr.msra.gmra.mrb[4].mxu1 %vm270_vm7, %v1523_v13 }
 0x160   :  { %485 = vmatpush1.bf16.msra.mxu0 %v1851_v56  ;;  %524 = vmatpush1.bf16.msra.mxu1 %v1814_v44  ;;  %v178_v44 = vld [vmem:[%s2414_s1] sm:$0xf] }
 0x161   :  { %1531 = vmatprep.subr.msk.bf16.mxu0 %vm121_vm2, %v1772_v32  ;;  %525 = vmatprep.subr.bf16.mxu1 %v1932_v12  ;;  %v2174_v52 = vpop.permute.xlu0 %681  ;;  %v693_v12 = vsel %vm689_vm5, %v2125_v26, %v2113_v18 }
 0x162   :  { %v2176_v48 = vpop.permute.xlu1 %673  ;;  %555 = vmatprep.mubr.bf16.mxu1 %v1665_v8  ;;  %v704_v57 = vsel %vm689_vm5, %v2024_v20, %v2174_v52 }
 0x163   :  { %v732_v20 = vsel %vm121_vm2, %v704_v57, 0 }
 0x164   :  { %487 = vmatpush1.bf16.msra.mxu0 %v462_v63  ;;  %526 = vmatpush1.bf16.msra.mxu1 %v1919_v9 }
 0x165   :  { %1533 = vmatprep.subr.msk.bf16.mxu1 %vm121_vm2, %v1777_v35  ;;  %564 = vmatprep.subr.bf16.mxu0 %v1888_v1  ;;  %v2188_v32 = vpop.permute.xlu0 %657 }
 0x166   :  { %v2190_v56 = vpop.permute.xlu1 %687  ;;  %v695_v58 = vsel %vm689_vm5, %v2188_v32, %v2165_v59 }
 0x167   :  { %1532 = vmatmul.mubr.msk.bf16.vlgmr.msra.gmra.mrb[8].mxu0 %vm270_vm7, %v178_v44  ;;  %v744_v24 = vsel %vm121_vm2, %v2190_v56, 0 }
 0x168   :  { %528 = vmatpush1.bf16.msra.mxu1 %v468_v39  ;;  %565 = vmatpush1.bf16.msra.mxu0 %v1900_v4  ;;  %v474_v4 = vsel %vm121_vm2, %v1808_v43, 0  ;;  %v480_v43 = vsel %vm121_vm2, %v1781_v37, 0  ;;  %v692_v37 = vsel %vm689_vm5, %v2111_v17, %v2125_v26 }
 0x169   :  { %566 = vmatprep.subr.bf16.mxu0 %v1906_v6  ;;  %v2197_v9 = vpop.permute.xlu0 %671  ;;  %1600 = vmatprep.subr.bf16.mxu1 %v1668_v27  ;;  %v690_v6 = vsel %vm689_vm5, %v2091_v0, %v2077_v54  ;;  %v694_v0 = vsel %vm689_vm5, %v2113_v18, %v2188_v32  ;;  %v1546_v32 = vld [vmem:[%s2414_s1 + $0xc] sm:$0xf] }
 0x16a   :  { %v2200_v35 = vpop.permute.xlu1 %922  ;;  %596 = vmatprep.mubr.bf16.mxu0 %v1665_v8  ;;  %v701_v2 = vsel %vm689_vm5, %v2197_v9, %v2176_v48  ;;  %v700_v7 = vsel %vm689_vm5, %v2163_v25, %v2197_v9 }
 0x16b   :  { %1534 = vmatmul.mubr.msk.bf16.vlgmr.msra.gmra.mrb[8].mxu1 %vm270_vm7, %v178_v44 }
 0x16c   :  { %567 = vmatpush1.bf16.msra.mxu0 %v1871_v61  ;;  %1601 = vmatpush3.bf16.msra.mxu1 %v1819_v46  ;;  %v691_v46 = vsel %vm689_vm5, %v2077_v54, %v2111_v17  ;;  %v726_v54 = vsel %vm121_vm2, %v2049_v28, 0  ;;  %v1538_v28 = vld [vmem:[%s2414_s1 + $0x8] sm:$0xf] }
 0x16d   :  { %1535 = vmatprep.subr.msk.bf16.mxu0 %vm121_vm2, %v1787_v38  ;;  %v686_v40 = vpop.permute.xlu0 %685  ;;  %1602 = vmatprep.subr.bf16.mxu1 %v1668_v27 }
 0x16e   :  { %v2209_v1 = vpop.permute.xlu1 %924  ;;  %1606 = vmatprep.mubr.msk.bf16.mxu1 %vm1669_vm8, %v1668_v27  ;;  %v706_v10 = vsel %vm689_vm5, %v2155_v21, %v686_v40  ;;  %v707_v11 = vsel %vm689_vm5, %v686_v40, %v2190_v56 }
 0x16f   :  { %v738_v18 = vsel %vm121_vm2, %v706_v10, 0  ;;  %v1554_v10 = vld [vmem:[%s2414_s1 + $0x10] sm:$0xf] }
 0x170   :  { %569 = vmatpush1.bf16.msra.mxu0 %v474_v4  ;;  %1603 = vmatpush3.bf16.msra.mxu1 %v1836_v51  ;;  %v697_v51 = vsel %vm689_vm5, %v2142_v41, %v2128_v30  ;;  %v963_v41 = vsel %vm960_vm9, %v2200_v35, %v2209_v1 }
 0x171   :  { %746 = vmatprep.subr.bf16.mxu0 %v691_v46  ;;  %v2219_v38 = vpop.permute.xlu0 %920  ;;  %1604 = vmatprep.subr.bf16.mxu1 %v1668_v27 }
 0x172   :  { %v2222_v61 = vpop.permute.xlu1 %934  ;;  %v962_v19 = vsel %vm960_vm9, %v2219_v38, %v2200_v35 }
 0x173   :  { %1536 = vmatmul.mubr.msk.bf16.vlgmr.msra.gmra.mrb[12].mxu0 %vm270_vm7, %v178_v44 }
 0x174   :  { %1605 = vmatpush3.bf16.msra.mxu1 %v480_v43  ;;  %747 = vmatpush1.bf16.msra.mxu0 %v690_v6 }
 0x175   :  { %748 = vmatprep.subr.bf16.mxu0 %v697_v51  ;;  %787 = vmatprep.subr.bf16.mxu1 %v693_v12  ;;  %v919_v15 = vpop.permute.xlu0 %918 }
 0x176   :  { %v2236_v45 = vpop.permute.xlu1 %932  ;;  %778 = vmatprep.mubr.bf16.mxu0 %v1665_v8  ;;  %v961_v26 = vsel %vm960_vm9, %v919_v15, %v2219_v38 }
 0x177   :  { %1607 = vmatmul.mubr.msk.bf16.vlgmr.msra.gmra.mrb[12].mxu1 %vm270_vm7, %v178_v44  ;;  %v967_v33 = vsel %vm960_vm9, %v2236_v45, %v2222_v61 }
 0x178   :  { %749 = vmatpush1.bf16.msra.mxu0 %v696_v47  ;;  %788 = vmatpush1.bf16.msra.mxu1 %v692_v37 }
 0x179   :  { %1539 = vmatprep.subr.msk.bf16.mxu0 %vm121_vm2, %v2053_v29  ;;  %789 = vmatprep.subr.bf16.mxu1 %v699_v49  ;;  %v2251_v50 = vpop.permute.xlu0 %926  ;;  %v705_v29 = vsel %vm689_vm5, %v2174_v52, %v2155_v21 }
 0x17a   :  { %v2253_v53 = vpop.permute.xlu1 %940  ;;  %819 = vmatprep.mubr.bf16.mxu1 %v1665_v8  ;;  %v964_v31 = vsel %vm960_vm9, %v2209_v1, %v2251_v50 }
 0x17c   :  { %751 = vmatpush1.bf16.msra.mxu0 %v726_v54  ;;  %790 = vmatpush1.bf16.msra.mxu1 %v698_v55 }
 0x17d   :  { %1541 = vmatprep.subr.msk.bf16.mxu1 %vm121_vm2, %v705_v29  ;;  %828 = vmatprep.subr.bf16.mxu0 %v695_v58  ;;  %v937_v60 = vpop.permute.xlu0 %936 }
 0x17e   :  { %v949_v62 = vpop.permute.xlu1 %948  ;;  %v968_v30 = vsel %vm960_vm9, %v2222_v61, %v937_v60 }
 0x17f   :  { %1540 = vmatmul.mubr.msk.bf16.vlgmr.msra.gmra.mrb[16].mxu0 %vm270_vm7, %v1538_v28 }
 0x180   :  { %792 = vmatpush1.bf16.msra.mxu1 %v732_v20  ;;  %829 = vmatpush1.bf16.msra.mxu0 %v694_v0 }
 0x181   :  { %830 = vmatprep.subr.bf16.mxu0 %v701_v2  ;;  %v939_v3 = vpop.permute.xlu0 %938  ;;  %1610 = vmatprep.subr.bf16.mxu1 %v1668_v27 }
 0x182   :  { %v953_v5 = vpop.permute.xlu1 %952  ;;  %860 = vmatprep.mubr.bf16.mxu0 %v1665_v8  ;;  %v970_v21 = vsel %vm960_vm9, %v939_v3, %v2253_v53 }
 0x183   :  { %1542 = vmatmul.mubr.msk.bf16.vlgmr.msra.gmra.mrb[16].mxu1 %vm270_vm7, %v1538_v28 }
 0x184   :  { %831 = vmatpush1.bf16.msra.mxu0 %v700_v7  ;;  %1611 = vmatpush3.bf16.msra.mxu1 %v2165_v59  ;;  %v969_v59 = vsel %vm960_vm9, %v937_v60, %v939_v3 }
 0x185   :  { %1543 = vmatprep.subr.msk.bf16.mxu0 %vm121_vm2, %v707_v11  ;;  %v947_v13 = vpop.permute.xlu0 %946  ;;  %1612 = vmatprep.subr.bf16.mxu1 %v1668_v27 }
 0x186   :  { %v929_v17 = vpop.permute.xlu1 %928  ;;  %1616 = vmatprep.mubr.msk.bf16.mxu1 %vm1669_vm8, %v1668_v27  ;;  %v973_v42 = vsel %vm960_vm9, %v947_v13, %v949_v62 }
 0x187   :  { %v997_v52 = vsel %vm121_vm2, %v973_v42, 0  ;;  %v965_v9 = vsel %vm960_vm9, %v2251_v50, %v929_v17 }
 0x188   :  { %833 = vmatpush1.bf16.msra.mxu0 %v738_v18  ;;  %1613 = vmatpush3.bf16.msra.mxu1 %v2176_v48 }
 0x189   :  { %1017 = vmatprep.subr.bf16.mxu0 %v962_v19  ;;  %v951_v14 = vpop.permute.xlu0 %950  ;;  %1614 = vmatprep.subr.bf16.mxu1 %v1668_v27 }
 0x18a   :  { %v943_v22 = vpop.permute.xlu1 %942  ;;  %v974_v16 = vsel %vm960_vm9, %v949_v62, %v951_v14  ;;  %v975_v48 = vsel %vm960_vm9, %v951_v14, %v953_v5 }
 0x18b   :  { %1544 = vmatmul.mubr.msk.bf16.vlgmr.msra.gmra.mrb[20].mxu0 %vm270_vm7, %v1538_v28  ;;  %v1003_v35 = vsel %vm121_vm2, %v975_v48, 0  ;;  %v971_v46 = vsel %vm960_vm9, %v2253_v53, %v943_v22 }
 0x18c   :  { %1615 = vmatpush3.bf16.msra.mxu1 %v744_v24  ;;  %1018 = vmatpush1.bf16.msra.mxu0 %v961_v26 }
 0x18d   :  { %1019 = vmatprep.subr.bf16.mxu0 %v968_v30  ;;  %1058 = vmatprep.subr.bf16.mxu1 %v964_v31  ;;  %v955_v34 = vpop.permute.xlu0 %954 }
 0x18e   :  { %v957_v36 = vpop.permute.xlu1 %956  ;;  %1049 = vmatprep.mubr.bf16.mxu0 %v1665_v8  ;;  %v976_v63 = vsel %vm960_vm9, %v953_v5, %v955_v34 }
 0x18f   :  { %1617 = vmatmul.mubr.msk.bf16.vlgmr.msra.gmra.mrb[20].mxu1 %vm270_vm7, %v1538_v28  ;;  %v977_v38 = vsel %vm960_vm9, %v955_v34, %v957_v36 }
 0x190   :  { %1020 = vmatpush1.bf16.msra.mxu0 %v967_v33  ;;  %1059 = vmatpush1.bf16.msra.mxu1 %v963_v41  ;;  %v1009_v51 = vsel %vm121_vm2, %v977_v38, 0 }
 0x191   :  { %1547 = vmatprep.subr.msk.bf16.mxu0 %vm121_vm2, %v974_v16  ;;  %1060 = vmatprep.subr.bf16.mxu1 %v970_v21  ;;  %v931_v23 = vpop.permute.xlu0 %930 }
 0x192   :  { %v1192_v25 = vpop.permute.xlu1 %1191  ;;  %1090 = vmatprep.mubr.bf16.mxu1 %v1665_v8  ;;  %v966_v44 = vsel %vm960_vm9, %v929_v17, %v931_v23 }
 0x194   :  { %1022 = vmatpush1.bf16.msra.mxu0 %v997_v52  ;;  %1061 = vmatpush1.bf16.msra.mxu1 %v969_v59 }
 0x195   :  { %1549 = vmatprep.subr.msk.bf16.mxu1 %vm121_vm2, %v976_v63  ;;  %1099 = vmatprep.subr.bf16.mxu0 %v966_v44  ;;  %v945_v56 = vpop.permute.xlu0 %944 }
 0x196   :  { %v1190_v39 = vpop.permute.xlu1 %1189  ;;  %v972_v40 = vsel %vm960_vm9, %v943_v22, %v945_v56 }
 0x197   :  { %1548 = vmatmul.mubr.msk.bf16.vlgmr.msra.gmra.mrb[24].mxu0 %vm270_vm7, %v1546_v32  ;;  %v1232_v37 = vsel %vm1231_vm10, %v1190_v39, %v1192_v25 }
 0x198   :  { %1063 = vmatpush1.bf16.msra.mxu1 %v1003_v35  ;;  %1100 = vmatpush1.bf16.msra.mxu0 %v965_v9 }
 0x199   :  { %1101 = vmatprep.subr.bf16.mxu0 %v972_v40  ;;  %v959_v1 = vpop.permute.xlu0 %958  ;;  %1620 = vmatprep.subr.bf16.mxu1 %v1668_v27 }
 0x19a   :  { %v2342_v4 = vpop.permute.xlu1 %1197  ;;  %1131 = vmatprep.mubr.bf16.mxu0 %v1665_v8  ;;  %v978_v61 = vsel %vm960_vm9, %v957_v36, %v959_v1  ;;  %v1015_v47 = vsel %vm121_vm2, %v959_v1, 0 }
 0x19b   :  { %1550 = vmatmul.mubr.msk.bf16.vlgmr.msra.gmra.mrb[24].mxu1 %vm270_vm7, %v1546_v32 }
 0x19c   :  { %1102 = vmatpush1.bf16.msra.mxu0 %v971_v46  ;;  %1621 = vmatpush3.bf16.msra.mxu1 %v931_v23 }
 0x19d   :  { %1551 = vmatprep.subr.msk.bf16.mxu0 %vm121_vm2, %v978_v61  ;;  %v1194_v6 = vpop.permute.xlu0 %1193  ;;  %1622 = vmatprep.subr.bf16.mxu1 %v1668_v27 }
 0x19e   :  { %v1208_v43 = vpop.permute.xlu1 %1207  ;;  %1626 = vmatprep.mubr.msk.bf16.mxu1 %vm1669_vm8, %v1668_v27  ;;  %v1233_v12 = vsel %vm1231_vm10, %v1192_v25, %v1194_v6 }
 0x1a0   :  { %1104 = vmatpush1.bf16.msra.mxu0 %v1009_v51  ;;  %1623 = vmatpush3.bf16.msra.mxu1 %v945_v56 }
 0x1a1   :  { %1288 = vmatprep.subr.bf16.mxu0 %v1233_v12  ;;  %v1196_v15 = vpop.permute.xlu0 %1195  ;;  %1624 = vmatprep.subr.bf16.mxu1 %v1668_v27 }
 0x1a2   :  { %v1210_v45 = vpop.permute.xlu1 %1209  ;;  %v1235_v49 = vsel %vm1231_vm10, %v1196_v15, %v2342_v4  ;;  %v1234_v55 = vsel %vm1231_vm10, %v1194_v6, %v1196_v15 }
 0x1a3   :  { %1552 = vmatmul.mubr.msk.bf16.vlgmr.msra.gmra.mrb[28].mxu0 %vm270_vm7, %v1546_v32  ;;  %v1240_v20 = vsel %vm1231_vm10, %v1208_v43, %v1210_v45 }
 0x1a4   :  { %1625 = vmatpush3.bf16.msra.mxu1 %v1015_v47  ;;  %1289 = vmatpush1.bf16.msra.mxu0 %v1232_v37 }
 0x1a5   :  { %1329 = vmatprep.subr.bf16.mxu1 %v1235_v49  ;;  %v1206_v50 = vpop.permute.xlu0 %1205  ;;  %1320 = vmatprep.mubr.bf16.mxu0 %v1665_v8 }
 0x1a6   :  { %v1218_v53 = vpop.permute.xlu1 %1217  ;;  %v1239_v54 = vsel %vm1231_vm10, %v1206_v50, %v1208_v43 }
 0x1a7   :  { %1627 = vmatmul.mubr.msk.bf16.vlgmr.msra.gmra.mrb[28].mxu1 %vm270_vm7, %v1546_v32  ;;  %1290 = vmatprep.subr.bf16.mxu0 %v1239_v54 }
 0x1a8   :  { %1330 = vmatpush1.bf16.msra.mxu1 %v1234_v55  ;;  %1361 = vmatprep.mubr.bf16.mxu1 %v1665_v8 }
 0x1a9   :  { %v1204_v57 = vpop.permute.xlu0 %1203 }
 0x1aa   :  { %v1238_v29 = vsel %vm1231_vm10, %v1204_v57, %v1206_v50  ;;  %v1222_v58 = vpop.permute.xlu1 %1221 }
 0x1ab   :  { %1291 = vmatpush1.bf16.msra.mxu0 %v1238_v29 }
 0x1ad   :  { %v1212_v28 = vpop.permute.xlu0 %1211 }
 0x1ae   :  { %v1226_v60 = vpop.permute.xlu1 %1225  ;;  %v1241_v62 = vsel %vm1231_vm10, %v1210_v45, %v1212_v28 }
 0x1af   :  { %1331 = vmatprep.subr.bf16.mxu1 %v1241_v62 }
 0x1b0   :  { %1332 = vmatpush1.bf16.msra.mxu1 %v1240_v20 }
 0x1b1   :  { %v1220_v0 = vpop.permute.xlu0 %1219 }
 0x1b2   :  { %v1244_v2 = vsel %vm1231_vm10, %v1218_v53, %v1220_v0  ;;  %v1245_v3 = vsel %vm1231_vm10, %v1220_v0, %v1222_v58  ;;  %v1202_v7 = vpop.permute.xlu1 %1201 }
 0x1b3   :  { %v1268_v5 = vsel %vm121_vm2, %v1244_v2, 0  ;;  %1555 = vmatprep.subr.msk.bf16.mxu0 %vm121_vm2, %v1245_v3 }
 0x1b4   :  { %1293 = vmatpush1.bf16.msra.mxu0 %v1268_v5 }
 0x1b5   :  { %v1224_v11 = vpop.permute.xlu0 %1223 }
 0x1b6   :  { %v1246_v13 = vsel %vm1231_vm10, %v1222_v58, %v1224_v11  ;;  %v1247_v17 = vsel %vm1231_vm10, %v1224_v11, %v1226_v60  ;;  %v1216_v14 = vpop.permute.xlu1 %1215 }
 0x1b7   :  { %v1274_v18 = vsel %vm121_vm2, %v1246_v13, 0  ;;  %1556 = vmatmul.mubr.msk.bf16.vlgmr.msra.gmra.mrb[32].mxu0 %vm270_vm7, %v1554_v10  ;;  %1557 = vmatprep.subr.msk.bf16.mxu1 %vm121_vm2, %v1247_v17 }
 0x1b8   :  { %1334 = vmatpush1.bf16.msra.mxu1 %v1274_v18  ;;  %1402 = vmatprep.mubr.bf16.mxu0 %v1665_v8 }
 0x1b9   :  { %v1200_v19 = vpop.permute.xlu0 %1199  ;;  %1630 = vmatprep.subr.bf16.mxu1 %v1668_v27 }
 0x1ba   :  { %v1236_v22 = vsel %vm1231_vm10, %v2342_v4, %v1200_v19  ;;  %v1237_v24 = vsel %vm1231_vm10, %v1200_v19, %v1202_v7  ;;  %v1230_v31 = vpop.permute.xlu1 %1229 }
 0x1bb   :  { %1558 = vmatmul.mubr.msk.bf16.vlgmr.msra.gmra.mrb[32].mxu1 %vm270_vm7, %v1554_v10  ;;  %1370 = vmatprep.subr.bf16.mxu0 %v1237_v24  ;;  %v1286_v33 = vsel %vm121_vm2, %v1230_v31, 0 }
 0x1bc   :  { %1371 = vmatpush1.bf16.msra.mxu0 %v1236_v22  ;;  %1631 = vmatpush3.bf16.msra.mxu1 %v1202_v7 }
 0x1bd   :  { %v1214_v26 = vpop.permute.xlu0 %1213  ;;  %1632 = vmatprep.subr.bf16.mxu1 %v1668_v27  ;;  %1636 = vmatprep.mubr.msk.bf16.mxu1 %vm1669_vm8, %v1668_v27 }
 0x1be   :  { %v1242_v8 = vsel %vm1231_vm10, %v1212_v28, %v1214_v26  ;;  %v1243_v30 = vsel %vm1231_vm10, %v1214_v26, %v1216_v14 }
 0x1bf   :  { %1372 = vmatprep.subr.bf16.mxu0 %v1243_v30 }
 0x1c0   :  { %1373 = vmatpush1.bf16.msra.mxu0 %v1242_v8  ;;  %1633 = vmatpush3.bf16.msra.mxu1 %v1216_v14 }
 0x1c1   :  { %v1228_v34 = vpop.permute.xlu0 %1227  ;;  %1634 = vmatprep.subr.bf16.mxu1 %v1668_v27 }
 0x1c2   :  { %v1248_v36 = vsel %vm1231_vm10, %v1226_v60, %v1228_v34  ;;  %v1249_v41 = vsel %vm1231_vm10, %v1228_v34, %v1230_v31 }
 0x1c3   :  { %v1280_v42 = vsel %vm121_vm2, %v1248_v36, 0  ;;  %1559 = vmatprep.subr.msk.bf16.mxu0 %vm121_vm2, %v1249_v41 }
 0x1c4   :  { %1375 = vmatpush1.bf16.msra.mxu0 %v1280_v42  ;;  %1635 = vmatpush3.bf16.msra.mxu1 %v1286_v33 }
 0x1c7   :  { %1560 = vmatmul.mubr.msk.bf16.vlgmr.msra.gmra.mrb[36].mxu0 %vm270_vm7, %v1554_v10  ;;  %1637 = vmatmul.mubr.msk.bf16.vlgmr.msra.gmra.mrb[36].mxu1 %vm270_vm7, %v1554_v10 }
 0x222   :  { %v329_v16 = vpop.f32.mrb[0].mxu0 }
 0x223   :  { %v331_v21 = vpop.f32.mrb[1].mxu0 }
 0x224   :  { %v333_v23 = vpop.f32.mrb[2].mxu0 }
 0x225   :  { %v334_v27 = vpop.f32.mrb[3].mxu0 }
 0x226   :  { %v370_v25 = vpop.f32.mrb[0].mxu1 }
 0x227   :  { %v372_v59 = vpop.f32.mrb[1].mxu1 }
 0x228   :  { %v374_v52 = vpop.f32.mrb[2].mxu1 }
 0x229   :  { %v375_v48 = vpop.f32.mrb[3].mxu1 }
 0x22e   :  { %v411_v63 = vpop.f32.mrb[4].mxu0 }
 0x22f   :  { %v413_v44 = vpop.f32.mrb[5].mxu0 }
 0x230   :  { %v415_v32 = vpop.f32.mrb[6].mxu0 }
 0x231   :  { %v416_v56 = vpop.f32.mrb[7].mxu0 }
 0x232   :  { %v452_v39 = vpop.f32.mrb[4].mxu1 }
 0x233   :  { %v1598_v9 = vpop.f32.mrb[5].mxu1 }
 0x234   :  { %v455_v35 = vpop.f32.mrb[6].mxu1 }
 0x235   :  { %v1599_v40 = vpop.f32.mrb[7].mxu1 }
 0x23a   :  { %v516_v1 = vpop.f32.mrb[8].mxu0 }
 0x23b   :  { %v517_v4 = vadd.f32 %v516_v1, %v329_v16  ;;  %v518_v46 = vpop.f32.mrb[9].mxu0 }
 0x23c   :  { %v519_v38 = vadd.f32 %v518_v46, %v331_v21  ;;  %v520_v61 = vpop.f32.mrb[10].mxu0 }
 0x23d   :  { %v521_v6 = vpop.f32.mrb[11].mxu0 }
 0x23e   :  { %v557_v43 = vpop.f32.mrb[8].mxu1 }
 0x23f   :  { %v558_v51 = vadd.f32 %v557_v43, %v370_v25  ;;  %v559_v12 = vpop.f32.mrb[9].mxu1  ;;  %v1462_v43 = vpop.permute.xlu0 %1461 }
 0x240   :  { %v560_v15 = vadd.f32 %v559_v12, %v372_v59  ;;  %v561_v45 = vpop.f32.mrb[10].mxu1 }
 0x241   :  { %v562_v37 = vpop.f32.mrb[11].mxu1 }
 0x246   :  { %v598_v47 = vpop.f32.mrb[12].mxu0 }
 0x247   :  { %v599_v49 = vadd.f32 %v598_v47, %v411_v63  ;;  %v600_v50 = vpop.f32.mrb[13].mxu0 }
 0x248   :  { %v601_v53 = vadd.f32 %v600_v50, %v413_v44  ;;  %v602_v54 = vpop.f32.mrb[14].mxu0 }
 0x249   :  { %v603_v55 = vpop.f32.mrb[15].mxu0 }
 0x24a   :  { %v639_v57 = vpop.f32.mrb[12].mxu1 }
 0x24b   :  { %v640_v29 = vadd.f32 %v639_v57, %v452_v39  ;;  %v1608_v58 = vpop.f32.mrb[13].mxu1 }
 0x24c   :  { %v642_v28 = vpop.f32.mrb[14].mxu1 }
 0x24d   :  { %v1609_v60 = vpop.f32.mrb[15].mxu1 }
 0x252   :  { %v780_v62 = vpop.f32.mrb[16].mxu0 }
 0x253   :  { %v909_v20 = vadd.f32 %v780_v62, %v517_v4  ;;  %v782_v0 = vpop.f32.mrb[17].mxu0 }
 0x254   :  { %v910_v2 = vadd.f32 %v782_v0, %v519_v38  ;;  %v784_v3 = vpop.f32.mrb[18].mxu0 }
 0x255   :  { %v785_v5 = vpop.f32.mrb[19].mxu0 }
 0x256   :  { %v821_v7 = vpop.f32.mrb[16].mxu1 }
 0x257   :  { %v911_v10 = vadd.f32 %v821_v7, %v558_v51  ;;  %v823_v11 = vpop.f32.mrb[17].mxu1 }
 0x258   :  { %v912_v13 = vadd.f32 %v823_v11, %v560_v15  ;;  %v825_v17 = vpop.f32.mrb[18].mxu1 }
 0x259   :  { %v826_v18 = vpop.f32.mrb[19].mxu1 }
 0x25e   :  { %v862_v19 = vpop.f32.mrb[20].mxu0 }
 0x25f   :  { %v913_v14 = vadd.f32 %v862_v19, %v599_v49  ;;  %v864_v22 = vpop.f32.mrb[21].mxu0 }
 0x260   :  { %v914_v24 = vadd.f32 %v864_v22, %v601_v53  ;;  %v866_v26 = vpop.f32.mrb[22].mxu0 }
 0x261   :  { %v867_v8 = vpop.f32.mrb[23].mxu0 }
 0x262   :  { %v903_v30 = vpop.f32.mrb[20].mxu1 }
 0x263   :  { %v915_v31 = vadd.f32 %v903_v30, %v640_v29  ;;  %v1618_v34 = vpop.f32.mrb[21].mxu1 }
 0x264   :  { %v906_v36 = vpop.f32.mrb[22].mxu1 }
 0x265   :  { %v1619_v41 = vpop.f32.mrb[23].mxu1 }
 0x26a   :  { %v1051_v33 = vpop.f32.mrb[24].mxu0 }
 0x26b   :  { %v1180_v42 = vadd.f32 %v1051_v33, %v909_v20  ;;  %v1053_v16 = vpop.f32.mrb[25].mxu0 }
 0x26c   :  { %v1181_v21 = vadd.f32 %v1053_v16, %v910_v2  ;;  %v1055_v23 = vpop.f32.mrb[26].mxu0 }
 0x26d   :  { %v1056_v27 = vpop.f32.mrb[27].mxu0 }
 0x26e   :  { %v1092_v25 = vpop.f32.mrb[24].mxu1 }
 0x26f   :  { %v1182_v59 = vadd.f32 %v1092_v25, %v911_v10  ;;  %v1094_v52 = vpop.f32.mrb[25].mxu1 }
 0x270   :  { %v1183_v48 = vadd.f32 %v1094_v52, %v912_v13  ;;  %v1096_v63 = vpop.f32.mrb[26].mxu1 }
 0x271   :  { %v1097_v44 = vpop.f32.mrb[27].mxu1 }
 0x276   :  { %v1133_v32 = vpop.f32.mrb[28].mxu0 }
 0x277   :  { %v1184_v56 = vadd.f32 %v1133_v32, %v913_v14  ;;  %v1135_v39 = vpop.f32.mrb[29].mxu0 }
 0x278   :  { %v1185_v9 = vadd.f32 %v1135_v39, %v914_v24  ;;  %v1137_v35 = vpop.f32.mrb[30].mxu0 }
 0x279   :  { %v1138_v40 = vpop.f32.mrb[31].mxu0 }
 0x27a   :  { %v1174_v1 = vpop.f32.mrb[28].mxu1 }
 0x27b   :  { %v1186_v4 = vadd.f32 %v1174_v1, %v915_v31  ;;  %v1628_v46 = vpop.f32.mrb[29].mxu1 }
 0x27c   :  { %v1177_v38 = vpop.f32.mrb[30].mxu1 }
 0x27d   :  { %v1629_v61 = vpop.f32.mrb[31].mxu1 }
 0x28a   :  { %v1322_v6 = vpop.f32.mrb[32].mxu0 }
 0x28b   :  { %v1451_v51 = vadd.f32 %v1322_v6, %v1180_v42  ;;  %v1324_v12 = vpop.f32.mrb[33].mxu0 }
 0x28c   :  { %v1452_v15 = vadd.f32 %v1324_v12, %v1181_v21  ;;  %v1326_v45 = vpop.f32.mrb[34].mxu0 }
 0x28d   :  { %v1464_v37 = vadd.f32 %v1462_v43, %v1451_v51  ;;  %v1327_v47 = vpop.f32.mrb[35].mxu0 }
 0x28e   :  { %v1465_v49 = vadd.f32 %v1462_v43, %v1452_v15  ;;  %v1363_v50 = vpop.f32.mrb[32].mxu1 }
 0x28f   :  { %v1471_v53 = vmax.f32 %v1464_v37, 0.0  ;;  %v1453_v54 = vadd.f32 %v1363_v50, %v1182_v59  ;;  %v1365_v55 = vpop.f32.mrb[33].mxu1 }
 0x290   :  { %v1472_v57 = vmax.f32 %v1465_v49, 0.0  ;;  %v1454_v29 = vadd.f32 %v1365_v55, %v1183_v48  ;;  %v1367_v58 = vpop.f32.mrb[34].mxu1 }
 0x291   :  { %v1466_v28 = vadd.f32 %v1462_v43, %v1453_v54  ;;  %v1368_v60 = vpop.f32.mrb[35].mxu1 }
 0x292   :  { %v1566_v62 = vpack.c.bf16 %v1472_v57, %v1471_v53  ;;  %v1467_v20 = vadd.f32 %v1462_v43, %v1454_v29 }
 0x293   :  { %v1473_v0 = vmax.f32 %v1466_v28, 0.0 }
 0x294   :  { %v1474_v2 = vmax.f32 %v1467_v20, 0.0  ;;  %1507 = vst [vmem:[%s2416_s3] sm:$0xff] %v1566_v62 }
 0x296   :  { %v1567_v3 = vpack.c.bf16 %v1474_v2, %v1473_v0 }
 0x298   :  { %1508 = vst [vmem:[%s2416_s3 + $0x8] sm:$0xff] %v1567_v3 }
 0x29a   :  { %v1404_v5 = vpop.f32.mrb[36].mxu0  ;;  %v1445_v7 = vpop.f32.mrb[36].mxu1 }
 0x29b   :  { %v1455_v10 = vadd.f32 %v1404_v5, %v1184_v56  ;;  %v1457_v11 = vadd.f32 %v1445_v7, %v1186_v4  ;;  %v1406_v13 = vpop.f32.mrb[37].mxu0  ;;  %v1638_v17 = vpop.f32.mrb[37].mxu1 }
 0x29c   :  { %v1456_v18 = vadd.f32 %v1406_v13, %v1185_v9  ;;  %v1408_v19 = vpop.f32.mrb[38].mxu0  ;;  %v1448_v14 = vpop.f32.mrb[38].mxu1 }
 0x29d   :  { %v1468_v22 = vadd.f32 %v1462_v43, %v1455_v10  ;;  %v1470_v24 = vadd.f32 %v1462_v43, %v1457_v11  ;;  %v1409_v26 = vpop.f32.mrb[39].mxu0  ;;  %v1639_v8 = vpop.f32.mrb[39].mxu1 }
 0x29e   :  { %v1469_v30 = vadd.f32 %v1462_v43, %v1456_v18 }
 0x29f   :  { %v1475_v31 = vmax.f32 %v1468_v22, 0.0  ;;  %v1477_v34 = vmax.f32 %v1470_v24, 0.0 }
 0x2a0   :  { %v1476_v36 = vmax.f32 %v1469_v30, 0.0 }
 0x2a1   :  { %v1569_v41 = vpack.c.bf16 %v1477_v34, %v1477_v34 }
 0x2a2   :  { %v1568_v33 = vpack.c.bf16 %v1476_v36, %v1475_v31 }
 0x2a3   :  { %1511 = vst.msk [vmem:[%s2416_s3 + $0x18] sm:$0xf] %vm1510_vm11, %v1569_v41 }
 0x2a4   :  { %1509 = vst [vmem:[%s2416_s3 + $0x10] sm:$0xff] %v1568_v33 }

// kernel: inception_forward.5
= control target key start
LH: loop header
LB: loop body
LE: loop exit
PB: predicated region body
PF: predicated region fallthrough
CT: control target
= control target key end

     0   :  { %s835_s16 = smov 127   ;;  %s836_s19 = smov 126   ;;  %vm69_vm0 = vcmask 1043456   ;;  %vm63_vm1 = vcmask 1031168   ;;  %vm45_vm2 = vcmask 1039360   ;;  %v838_v25 = vmov 0   ;;  %s1055_s0 = inlined_call_operand.vmem [shape: bf16[8,972], index: 0, kind: input, shape index: {}]   ;;  %s1056_s1 = inlined_call_operand.vmem [shape: bf16[3,16,24], index: 1, kind: input, shape index: {}]   ;;  %s1057_s2 = inlined_call_operand.vmem [shape: f32[16,1], index: 2, kind: input, shape index: {}]   ;;  %s1058_s3 = inlined_call_operand.vmem [shape: bf16[16,648], index: 3, kind: output, shape index: {}]  }
   0x1   :  { %v16_v0 = vld [vmem:[%s1055_s0 + $0x8] sm:$0xff]  ;;  %v15_v1 = vld [vmem:[%s1055_s0] sm:$0xff]  ;;  %v17_v6 = vld [vmem:[%s1055_s0 + $0x10] sm:$0xff]  ;;  %s837_s0 = smov 110   ;;  %205 = vmatprep.mubr.bf16.mxu1 %v838_v25  ;;  %291 = vmatprep.mubr.bf16.mxu0 %v838_v25  ;;  %s839_s20 = smov 92   ;;  %vm134_vm3 = vcmask 900096  }
   0x2   :  { %v866_v2 = vcombine.high %v16_v0, %v16_v0  ;;  %v753_v3 = vcombine.high %v15_v1, %v15_v1  ;;  %v754_v4 = vcombine.low %v16_v0, %v16_v0  ;;  %v752_v5 = vcombine.low %v15_v1, %v15_v1  ;;  %824 = vset.pattern.permute.xlu0 %v838_v25  ;;  %v668_v38 = vld [vmem:[%s1057_s2] sm:$0xff]  ;;  %v669_v39 = vld [vmem:[%s1057_s2 + $0x8] sm:$0xff] }
   0x3   :  { %v756_v7 = vcombine.low %v17_v6, %v17_v6  ;;  %v757_v8 = vcombine.high %v17_v6, %v17_v6  ;;  %825 = vset.pattern.permute.xlu1 %v838_v25  ;;  %v832_v57 = vld [vmem:[%s1056_s1 + $0x8] sm:$0xff]   ;;  %vm151_vm4 = vcmask 195584   ;;  %vm489_vm5 = vcmask 752640  }
   0x4   :  { %39 = vrot.lane.b32.xlu1 %v866_v2, %s835_s16  ;;  %35 = vrot.lane.b32.xlu0 %v753_v3, %s835_s16  ;;  %vm742_vm6 = vcmask 64516  }
   0x5   :  { %vm743_vm7 = vmor %vm742_vm6, %vm69_vm0 }
   0x8   :  { %37 = vrot.lane.b32.xlu0 %v754_v4, %s835_s16  ;;  %33 = vrot.lane.b32.xlu1 %v752_v5, %s835_s16 }
   0xc   :  { %41 = vrot.lane.b32.xlu0 %v756_v7, %s835_s16  ;;  %43 = vrot.lane.b32.xlu1 %v757_v8, %s835_s16 }
  0x10   :  { %51 = vrot.lane.b32.xlu0 %v752_v5, %s836_s19  ;;  %53 = vrot.lane.b32.xlu1 %v753_v3, %s836_s19 }
  0x14   :  { %55 = vrot.lane.b32.xlu0 %v754_v4, %s836_s19  ;;  %57 = vrot.lane.b32.xlu1 %v866_v2, %s836_s19 }
  0x18   :  { %59 = vrot.lane.b32.xlu0 %v756_v7, %s836_s19  ;;  %61 = vrot.lane.b32.xlu1 %v757_v8, %s836_s19 }
  0x76   :  { %v40_v9 = vpop.permute.xlu1 %39  ;;  %v36_v10 = vpop.permute.xlu0 %35 }
  0x7a   :  { %v38_v11 = vpop.permute.xlu0 %37  ;;  %v34_v12 = vpop.permute.xlu1 %33 }
  0x7b   :  { %v47_v23 = vsel %vm45_vm2, %v36_v10, %v38_v11  ;;  %v48_v24 = vsel %vm45_vm2, %v38_v11, %v40_v9  ;;  %v46_v28 = vsel %vm45_vm2, %v34_v12, %v36_v10 }
  0x7c   :  { %v898_v26 = vsel %vm69_vm0, %v753_v3, %v47_v23  ;;  %v901_v27 = vsel %vm69_vm0, %v754_v4, %v48_v24  ;;  %v914_v31 = vsel %vm69_vm0, %v752_v5, %v46_v28  ;;  %v833_v5 = vld [vmem:[%s1056_s1] sm:$0xff]   ;;  %v834_v23 = vld [vmem:[%s1056_s1 + $0x10] sm:$0xff]  }
  0x7e   :  { %v42_v13 = vpop.permute.xlu0 %41  ;;  %v44_v14 = vpop.permute.xlu1 %43 }
  0x7f   :  { %v874_v15 = vsel %vm69_vm0, %v757_v8, %v44_v14  ;;  %v50_v29 = vsel %vm45_vm2, %v42_v13, %v44_v14  ;;  %v49_v35 = vsel %vm45_vm2, %v40_v9, %v42_v13 }
  0x80   :  { %120 = vrot.lane.b32.xlu0 %v874_v15, %s837_s0  ;;  %v917_v32 = vsel %vm69_vm0, %v756_v7, %v50_v29  ;;  %v934_v36 = vsel %vm69_vm0, %v866_v2, %v49_v35 }
  0x82   :  { %v52_v16 = vpop.permute.xlu0 %51  ;;  %v54_v17 = vpop.permute.xlu1 %53 }
  0x83   :  { %v879_v18 = vsel %vm63_vm1, %v52_v16, %v54_v17 }
  0x84   :  { %122 = vrot.lane.b32.xlu1 %v879_v18, %s837_s0  ;;  %v311_v4 = vsel %vm69_vm0, %v879_v18, 0 }
  0x86   :  { %v56_v19 = vpop.permute.xlu0 %55  ;;  %v58_v20 = vpop.permute.xlu1 %57 }
  0x87   :  { %v884_v21 = vsel %vm63_vm1, %v54_v17, %v56_v19  ;;  %v887_v22 = vsel %vm63_vm1, %v56_v19, %v58_v20 }
  0x88   :  { %124 = vrot.lane.b32.xlu0 %v884_v21, %s837_s0  ;;  %126 = vrot.lane.b32.xlu1 %v887_v22, %s837_s0  ;;  %v317_v10 = vsel %vm69_vm0, %v887_v22, 0 }
  0x8a   :  { %v911_v30 = vpop.permute.xlu1 %61  ;;  %v60_v33 = vpop.permute.xlu0 %59 }
  0x8b   :  { %v925_v34 = vsel %vm63_vm1, %v60_v33, %v911_v30  ;;  %v937_v37 = vsel %vm63_vm1, %v58_v20, %v60_v33 }
  0x8c   :  { %112 = vrot.lane.b32.xlu0 %v898_v26, %s837_s0  ;;  %114 = vrot.lane.b32.xlu1 %v901_v27, %s837_s0  ;;  %v323_v11 = vsel %vm69_vm0, %v925_v34, 0 }
  0x90   :  { %110 = vrot.lane.b32.xlu0 %v914_v31, %s837_s0  ;;  %118 = vrot.lane.b32.xlu1 %v917_v32, %s837_s0 }
  0x94   :  { %130 = vrot.lane.b32.xlu0 %v925_v34, %s837_s0  ;;  %132 = vrot.lane.b32.xlu1 %v911_v30, %s837_s0 }
  0x98   :  { %116 = vrot.lane.b32.xlu0 %v934_v36, %s837_s0  ;;  %128 = vrot.lane.b32.xlu1 %v937_v37, %s837_s0 }
  0x9c   :  { %479 = vrot.lane.b32.xlu0 %v884_v21, %s839_s20  ;;  %477 = vrot.lane.b32.xlu1 %v879_v18, %s839_s20 }
  0xa0   :  { %467 = vrot.lane.b32.xlu0 %v898_v26, %s839_s20  ;;  %481 = vrot.lane.b32.xlu1 %v887_v22, %s839_s20 }
  0xa4   :  { %465 = vrot.lane.b32.xlu0 %v914_v31, %s839_s20  ;;  %469 = vrot.lane.b32.xlu1 %v901_v27, %s839_s20 }
  0xa8   :  { %475 = vrot.lane.b32.xlu0 %v874_v15, %s839_s20  ;;  %483 = vrot.lane.b32.xlu1 %v937_v37, %s839_s20 }
  0xac   :  { %471 = vrot.lane.b32.xlu0 %v934_v36, %s839_s20  ;;  %473 = vrot.lane.b32.xlu1 %v917_v32, %s839_s20 }
  0xb0   :  { %485 = vrot.lane.b32.xlu0 %v925_v34, %s839_s20  ;;  %487 = vrot.lane.b32.xlu1 %v911_v30, %s839_s20 }
  0xb4   :  { %672 = vperm.xlu0 %824, %v668_v38   ;;  %677 = vperm.xlu1 %825, %v669_v39  }
  0xf2   :  { %v121_v40 = vpop.permute.xlu0 %120 }
  0xf3   :  { %259 = vmatprep.subr.bf16.mxu0 %v121_v40 }
  0xf6   :  { %v123_v41 = vpop.permute.xlu1 %122 }
  0xfa   :  { %v125_v42 = vpop.permute.xlu0 %124  ;;  %v127_v43 = vpop.permute.xlu1 %126 }
  0xfb   :  { %v140_v51 = vsel %vm134_vm3, %v123_v41, %v125_v42  ;;  %v141_v52 = vsel %vm134_vm3, %v125_v42, %v127_v43 }
  0xfc   :  { %v156_v56 = vsel %vm69_vm0, %v140_v51, 0 }
  0xfe   :  { %v113_v44 = vpop.permute.xlu0 %112  ;;  %v115_v45 = vpop.permute.xlu1 %114 }
  0xff   :  { %v136_v46 = vsel %vm134_vm3, %v113_v44, %v115_v45 }
 0x100   :  { %173 = vmatprep.subr.bf16.mxu1 %v136_v46 }
 0x102   :  { %v111_v47 = vpop.permute.xlu0 %110  ;;  %v119_v48 = vpop.permute.xlu1 %118 }
 0x103   :  { %v135_v49 = vsel %vm134_vm3, %v111_v47, %v113_v44  ;;  %v139_v50 = vsel %vm134_vm3, %v119_v48, %v121_v40 }
 0x104   :  { %174 = vmatpush1.bf16.msra.mxu1 %v135_v49  ;;  %260 = vmatpush1.bf16.msra.mxu0 %v139_v50 }
 0x105   :  { %761 = vmatprep.subr.msk.bf16.mxu1 %vm69_vm0, %v141_v52 }
 0x106   :  { %v131_v53 = vpop.permute.xlu0 %130  ;;  %v133_v54 = vpop.permute.xlu1 %132 }
 0x107   :  { %v144_v55 = vsel %vm134_vm3, %v131_v53, %v133_v54  ;;  %765 = vmatprep.subr.msk.bf16.mxu0 %vm69_vm0, %v133_v54 }
 0x108   :  { %176 = vmatpush1.bf16.msra.mxu1 %v156_v56  ;;  %v168_v58 = vsel %vm69_vm0, %v144_v55, 0 }
 0x109   :  { %262 = vmatpush1.bf16.msra.mxu0 %v168_v58 }
 0x10a   :  { %v117_v59 = vpop.permute.xlu0 %116  ;;  %328 = vmatprep.subr.bf16.mxu0 %v898_v26  ;;  %v129_v60 = vpop.permute.xlu1 %128 }
 0x10b   :  { %v137_v61 = vsel %vm134_vm3, %v115_v45, %v117_v59  ;;  %762 = vmatmul.mubr.msk.bf16.vlgmr.msra.gmra.mrb[0].mxu1 %vm151_vm4, %v832_v57  ;;  %v138_v62 = vsel %vm134_vm3, %v117_v59, %v119_v48  ;;  %v142_v63 = vsel %vm134_vm3, %v127_v43, %v129_v60  ;;  %v143_v0 = vsel %vm134_vm3, %v129_v60, %v131_v53 }
 0x10c   :  { %216 = vmatprep.subr.bf16.mxu1 %v138_v62  ;;  %766 = vmatmul.mubr.msk.bf16.vlgmr.msra.gmra.mrb[0].mxu0 %vm151_vm4, %v832_v57  ;;  %v162_v3 = vsel %vm69_vm0, %v142_v63, 0 }
 0x10d   :  { %217 = vmatpush1.bf16.msra.mxu1 %v137_v61  ;;  %329 = vmatpush1.bf16.msra.mxu0 %v914_v31 }
 0x10e   :  { %v480_v1 = vpop.permute.xlu0 %479  ;;  %763 = vmatprep.subr.msk.bf16.mxu1 %vm69_vm0, %v143_v0  ;;  %768 = vmatprep.subr.msk.bf16.mxu0 %vm69_vm0, %v884_v21  ;;  %v478_v2 = vpop.permute.xlu1 %477 }
 0x10f   :  { %248 = vmatprep.mubr.bf16.mxu1 %v838_v25  ;;  %360 = vmatprep.mubr.bf16.mxu0 %v838_v25  ;;  %v495_v16 = vsel %vm489_vm5, %v478_v2, %v480_v1 }
 0x110   :  { %v510_v22 = vsel %vm69_vm0, %v495_v16, 0 }
 0x111   :  { %219 = vmatpush1.bf16.msra.mxu1 %v162_v3  ;;  %331 = vmatpush1.bf16.msra.mxu0 %v311_v4 }
 0x112   :  { %v468_v6 = vpop.permute.xlu0 %467  ;;  %371 = vmatprep.subr.bf16.mxu1 %v934_v36  ;;  %414 = vmatprep.subr.bf16.mxu0 %v874_v15  ;;  %v482_v7 = vpop.permute.xlu1 %481 }
 0x113   :  { %v496_v17 = vsel %vm489_vm5, %v480_v1, %v482_v7 }
 0x114   :  { %764 = vmatmul.mubr.msk.bf16.vlgmr.msra.gmra.mrb[4].mxu1 %vm151_vm4, %v832_v57  ;;  %769 = vmatmul.mubr.msk.bf16.vlgmr.msra.gmra.mrb[4].mxu0 %vm151_vm4, %v833_v5 }
 0x115   :  { %372 = vmatpush1.bf16.msra.mxu1 %v901_v27  ;;  %415 = vmatpush1.bf16.msra.mxu0 %v917_v32 }
 0x116   :  { %v466_v8 = vpop.permute.xlu0 %465  ;;  %770 = vmatprep.subr.msk.bf16.mxu1 %vm69_vm0, %v937_v37  ;;  %772 = vmatprep.subr.msk.bf16.mxu0 %vm69_vm0, %v911_v30  ;;  %v470_v9 = vpop.permute.xlu1 %469 }
 0x117   :  { %446 = vmatprep.mubr.bf16.mxu0 %v838_v25  ;;  %403 = vmatprep.mubr.bf16.mxu1 %v838_v25  ;;  %v491_v12 = vsel %vm489_vm5, %v468_v6, %v470_v9  ;;  %v490_v15 = vsel %vm489_vm5, %v466_v8, %v468_v6 }
 0x119   :  { %374 = vmatpush1.bf16.msra.mxu1 %v317_v10  ;;  %417 = vmatpush1.bf16.msra.mxu0 %v323_v11 }
 0x11a   :  { %v476_v13 = vpop.permute.xlu0 %475  ;;  %527 = vmatprep.subr.bf16.mxu0 %v491_v12  ;;  %v484_v14 = vpop.permute.xlu1 %483 }
 0x11b   :  { %v497_v24 = vsel %vm489_vm5, %v482_v7, %v484_v14 }
 0x11c   :  { %773 = vmatmul.mubr.msk.bf16.vlgmr.msra.gmra.mrb[0].mxu0 %vm151_vm4, %v833_v5  ;;  %v516_v29 = vsel %vm69_vm0, %v497_v24, 0 }
 0x11d   :  { %528 = vmatpush1.bf16.msra.mxu0 %v490_v15  ;;  %559 = vmatprep.mubr.bf16.mxu0 %v838_v25 }
 0x11e   :  { %v472_v18 = vpop.permute.xlu0 %471  ;;  %777 = vmatprep.subr.msk.bf16.mxu0 %vm69_vm0, %v496_v17  ;;  %v474_v19 = vpop.permute.xlu1 %473 }
 0x11f   :  { %v492_v20 = vsel %vm489_vm5, %v470_v9, %v472_v18  ;;  %v493_v21 = vsel %vm489_vm5, %v472_v18, %v474_v19  ;;  %v494_v30 = vsel %vm489_vm5, %v474_v19, %v476_v13 }
 0x120   :  { %771 = vmatmul.mubr.msk.bf16.vlgmr.msra.gmra.mrb[4].mxu1 %vm151_vm4, %v833_v5  ;;  %570 = vmatprep.subr.bf16.mxu1 %v493_v21 }
 0x121   :  { %530 = vmatpush1.bf16.msra.mxu0 %v510_v22  ;;  %571 = vmatpush1.bf16.msra.mxu1 %v492_v20 }
 0x122   :  { %v486_v26 = vpop.permute.xlu0 %485  ;;  %613 = vmatprep.subr.bf16.mxu0 %v476_v13  ;;  %v488_v27 = vpop.permute.xlu1 %487  ;;  %602 = vmatprep.mubr.bf16.mxu1 %v838_v25 }
 0x123   :  { %v498_v28 = vsel %vm489_vm5, %v484_v14, %v486_v26  ;;  %v499_v31 = vsel %vm489_vm5, %v486_v26, %v488_v27 }
 0x124   :  { %778 = vmatmul.mubr.msk.bf16.vlgmr.msra.gmra.mrb[4].mxu0 %vm151_vm4, %v834_v23  ;;  %779 = vmatprep.subr.msk.bf16.mxu1 %vm69_vm0, %v498_v28  ;;  %v522_v32 = vsel %vm69_vm0, %v499_v31, 0 }
 0x125   :  { %573 = vmatpush1.bf16.msra.mxu1 %v516_v29  ;;  %614 = vmatpush1.bf16.msra.mxu0 %v494_v30 }
 0x126   :  { %781 = vmatprep.subr.msk.bf16.mxu0 %vm69_vm0, %v488_v27  ;;  %645 = vmatprep.mubr.bf16.mxu0 %v838_v25 }
 0x129   :  { %616 = vmatpush1.bf16.msra.mxu0 %v522_v32 }
 0x12c   :  { %780 = vmatmul.mubr.msk.bf16.vlgmr.msra.gmra.mrb[4].mxu1 %vm151_vm4, %v834_v23  ;;  %782 = vmatmul.mubr.msk.bf16.vlgmr.msra.gmra.mrb[0].mxu0 %vm151_vm4, %v834_v23 }
 0x133   :  { %v673_v38 = vpop.permute.xlu0 %672  ;;  %v678_v43 = vpop.permute.xlu1 %677 }
 0x1de   :  { %v207_v33 = vpop.f32.mrb[0].mxu1 }
 0x1df   :  { %v209_v34 = vpop.f32.mrb[1].mxu1 }
 0x1e0   :  { %v211_v35 = vpop.f32.mrb[2].mxu1 }
 0x1e1   :  { %v213_v36 = vpop.f32.mrb[3].mxu1 }
 0x1f7   :  { %v561_v37 = vpop.f32.mrb[4].mxu0 }
 0x1f8   :  { %v795_v39 = vadd.f32 %v561_v37, %v207_v33  ;;  %v563_v40 = vpop.f32.mrb[5].mxu0 }
 0x1f9   :  { %v796_v41 = vadd.f32 %v563_v40, %v209_v34  ;;  %v565_v42 = vpop.f32.mrb[6].mxu0 }
 0x1fa   :  { %v680_v44 = vadd.f32 %v795_v39, %v673_v38  ;;  %v797_v25 = vadd.f32 %v565_v42, %v211_v35  ;;  %v567_v45 = vpop.f32.mrb[7].mxu0 }
 0x1fb   :  { %v681_v46 = vadd.f32 %v796_v41, %v673_v38  ;;  %v798_v47 = vadd.f32 %v567_v45, %v213_v36 }
 0x1fc   :  { %v692_v48 = vmax.f32 %v680_v44, 0.0  ;;  %v686_v49 = vadd.f32 %v797_v25, %v678_v43 }
 0x1fd   :  { %v693_v50 = vmax.f32 %v681_v46, 0.0  ;;  %v687_v51 = vadd.f32 %v798_v47, %v678_v43 }
 0x1fe   :  { %v698_v52 = vmax.f32 %v686_v49, 0.0 }
 0x1ff   :  { %v789_v53 = vpack.c.bf16 %v693_v50, %v692_v48  ;;  %v699_v54 = vmax.f32 %v687_v51, 0.0  ;;  %v604_v55 = vpop.f32.mrb[4].mxu1  ;;  %v647_v56 = vpop.f32.mrb[0].mxu0 }
 0x200   :  { %v682_v57 = vadd.f32 %v673_v38, %v604_v55  ;;  %v684_v58 = vadd.f32 %v673_v38, %v647_v56  ;;  %v606_v59 = vpop.f32.mrb[5].mxu1  ;;  %v649_v60 = vpop.f32.mrb[1].mxu0 }
 0x201   :  { %740 = vst [vmem:[%s1058_s3] sm:$0xff] %v789_v53  ;;  %v792_v61 = vpack.c.bf16 %v699_v54, %v698_v52  ;;  %v683_v62 = vadd.f32 %v673_v38, %v606_v59  ;;  %v685_v63 = vadd.f32 %v673_v38, %v649_v60  ;;  %v608_v0 = vpop.f32.mrb[6].mxu1  ;;  %v651_v1 = vpop.f32.mrb[2].mxu0 }
 0x202   :  { %v694_v2 = vmax.f32 %v682_v57, 0.0  ;;  %v696_v3 = vmax.f32 %v684_v58, 0.0  ;;  %v688_v4 = vadd.f32 %v678_v43, %v608_v0  ;;  %v690_v5 = vadd.f32 %v678_v43, %v651_v1  ;;  %v610_v6 = vpop.f32.mrb[7].mxu1  ;;  %v653_v7 = vpop.f32.mrb[3].mxu0 }
 0x203   :  { %745 = vst [vmem:[%s1058_s3 + $0x18] sm:$0xff] %v792_v61  ;;  %v695_v8 = vmax.f32 %v683_v62, 0.0  ;;  %v697_v9 = vmax.f32 %v685_v63, 0.0  ;;  %v689_v10 = vadd.f32 %v678_v43, %v610_v6  ;;  %v691_v11 = vadd.f32 %v678_v43, %v653_v7 }
 0x204   :  { %v700_v12 = vmax.f32 %v688_v4, 0.0  ;;  %v702_v13 = vmax.f32 %v690_v5, 0.0 }
 0x205   :  { %v790_v14 = vpack.c.bf16 %v695_v8, %v694_v2  ;;  %v791_v15 = vpack.c.bf16 %v697_v9, %v696_v3  ;;  %v701_v16 = vmax.f32 %v689_v10, 0.0  ;;  %v703_v17 = vmax.f32 %v691_v11, 0.0 }
 0x207   :  { %741 = vst [vmem:[%s1058_s3 + $0x8] sm:$0xff] %v790_v14  ;;  %744 = vst.msk [vmem:[%s1058_s3 + $0x10] sm:$0xff] %vm743_vm7, %v791_v15  ;;  %v793_v18 = vpack.c.bf16 %v701_v16, %v700_v12  ;;  %v794_v19 = vpack.c.bf16 %v703_v17, %v702_v13 }
 0x209   :  { %746 = vst [vmem:[%s1058_s3 + $0x20] sm:$0xff] %v793_v18  ;;  %747 = vst.msk [vmem:[%s1058_s3 + $0x28] sm:$0xff] %vm743_vm7, %v794_v19 }

</bundles_post_ra>
